<compile_context>
chip_gen: v6e
topology: v6e:2x2x1
jax: 0.10.0
libtpu: 0.0.40
codegen_flags: <defaults>
</compile_context>

<pallas_src>
import math

import jax
import jax.numpy as jnp
from jax.experimental import pallas as pl
from jax.experimental.pallas import tpu as pltpu


def _lff_kernel(x_ref, w_ref, b_ref, o_ref):
    # MXU matmul -> bias add (VPU) -> sin, cast at the store (lane-dense vst).
    y = jnp.dot(x_ref[...], w_ref[...], preferred_element_type=jnp.float32)
    o_ref[...] = jnp.sin(y + b_ref[...]).astype(o_ref.dtype)


def _choose_pack(d_in, d_out, max_weight_bytes=4 << 20):
    """Row-packing factor for a lane-dense kernel.

    Picks pack >= 1 such that pack*d_out is a multiple of 128 (unmasked
    stores), then grows it until pack*d_in >= 128 (lane-dense LHS, efficient
    DMA rows) and pack*d_out is a multiple of 256 (fills the 256-wide MXU on
    v6e/v7x), while keeping the kron'd weight (pack^2*d_in*d_out*4 B) small.
    Returns 1 when no cheap packing exists (the caller then zero-pads d_out).
    """
    def w_bytes(p):
        return p * p * d_in * d_out * 4

    base = 128 // math.gcd(d_out, 128)
    if w_bytes(base) > max_weight_bytes:
        return 1
    pack = base
    while (pack * d_in < 128 or (pack * d_out) % 256 != 0) and pack < 256:
        if w_bytes(pack * 2) > max_weight_bytes:
            break
        pack *= 2
    return pack


def lff_forward(x, weight, bias, *, tile_rows=4096, out_dtype=jnp.float32):
    """x: (B, D_in), weight: (D_out, D_in) [PyTorch layout], bias: (D_out,)."""
    x = jnp.asarray(x, jnp.float32)
    weight = jnp.asarray(weight, jnp.float32)
    bias = jnp.asarray(bias, jnp.float32)

    batch, d_in = x.shape
    d_out = weight.shape[0]

    # Fold the 2*pi input scale into the (tiny, O(d_in*d_out)) weight once.
    w_t = (2.0 * jnp.pi) * weight.T                       # (d_in, d_out)

    pack = _choose_pack(d_in, d_out)

    if pack > 1:
        # Block-diagonal weight + tiled bias: `pack` consecutive batch rows are
        # folded into one lane-dense row of width pack*d_out (>=128, %256==0).
        w_k = jnp.kron(jnp.eye(pack, dtype=jnp.float32), w_t)
        b_k = jnp.tile(bias, pack).reshape(1, pack * d_out)
        d_out_k = pack * d_out
    else:
        # Fallback: pad d_out up to a multiple of 128 with zero weight columns
        # so the store stays unmasked; the columns are sliced off afterwards.
        d_out_k = max(128, ((d_out + 127) // 128) * 128)
        w_k = jnp.pad(w_t, ((0, 0), (0, d_out_k - d_out)))
        b_k = jnp.pad(bias, (0, d_out_k - d_out)).reshape(1, d_out_k)

    d_in_k = pack * d_in

    # Packed-row count, padded only to a sublane-aligned (multiple-of-8) count.
    # This is the only situation that copies x (jnp.pad); batches that are
    # already multiples of 8*pack are passed through copy-free.  Zero-padded
    # rows compute sin(bias) and are sliced off afterwards.
    packed_rows = pl.cdiv(batch, pack)
    packed_rows_padded = max(8, ((packed_rows + 7) // 8) * 8)
    padded_batch = packed_rows_padded * pack
    if padded_batch != batch:
        x = jnp.pad(x, ((0, padded_batch - batch), (0, 0)))

    # Pure row-major reinterpretation (done in the wrapper, never in-kernel).
    x_k = x.reshape(packed_rows_padded, d_in_k)

    # Row-tile selection: as big as the requested size / VMEM budget allows
    # (amortizes per-grid-step overhead), shrunk for small inputs.
    out_itemsize = jnp.dtype(out_dtype).itemsize
    in_row_bytes = ((d_in_k + 127) // 128) * 128 * 4          # lane-padded f32
    out_row_bytes = ((d_out_k + 127) // 128) * 128 * out_itemsize
    vmem_budget = 24 * 1024 * 1024                            # pipelined buffers
    tm_cap = max(8, (vmem_budget // (2 * (in_row_bytes + out_row_bytes))) // 8 * 8)
    tm = min(tile_rows, tm_cap, packed_rows_padded)
    tm = max(8, (tm // 8) * 8)
    n_tiles = pl.cdiv(packed_rows_padded, tm)   # partial last tile is allowed

    out_packed = pl.pallas_call(
        _lff_kernel,
        out_shape=jax.ShapeDtypeStruct((packed_rows_padded, d_out_k), out_dtype),
        grid=(n_tiles,),
        in_specs=[
            pl.BlockSpec((tm, d_in_k), lambda i: (i, 0)),
            pl.BlockSpec((d_in_k, d_out_k), lambda i: (0, 0)),   # resident weight
            pl.BlockSpec((1, d_out_k), lambda i: (0, 0)),        # resident bias
        ],
        out_specs=pl.BlockSpec((tm, d_out_k), lambda i: (i, 0)),
        compiler_params=pltpu.CompilerParams(
            dimension_semantics=("parallel",),        # batch axis is independent
            vmem_limit_bytes=32 * 1024 * 1024,        # raise v5e's 16 MiB default
        ),
    )(x_k, w_k, b_k)

    if pack > 1:
        out = out_packed.reshape(padded_batch, d_out)
    else:
        out = out_packed[:, :d_out]
    if out.shape[0] != batch:
        out = out[:batch]
    return out


def lff_reference(x, weight, bias):
    # Pure-JAX reference mirroring the PyTorch forward.
    return jnp.sin((2.0 * jnp.pi * x) @ weight.T + bias)


if __name__ == "__main__":
    # Module config (small, consistent with nn.Linear(input_dim, 2*mapping_size)).
    input_dim = 8
    mapping_size = 32
    output_dim = 2 * mapping_size
    scale = 1.0
    batch = 16

    key = jax.random.PRNGKey(0)
    k_x, k_w, k_b = jax.random.split(key, 3)

    # Deterministic parameter init matching the module's __init__:
    #   weight ~ Normal(0, scale / input_dim), shape (output_dim, input_dim)
    #   bias   ~ Uniform(-1/sqrt(input_dim), 1/sqrt(input_dim))  (PyTorch default)
    weight = (scale / input_dim) * jax.random.normal(
        k_w, (output_dim, input_dim), dtype=jnp.float32
    )
    bound = 1.0 / math.sqrt(input_dim)
    bias = jax.random.uniform(
        k_b, (output_dim,), minval=-bound, maxval=bound, dtype=jnp.float32
    )

    x = jax.random.normal(k_x, (batch, input_dim), dtype=jnp.float32)

    out = jax.block_until_ready(lff_forward(x, weight, bias))
    ref = lff_reference(x, weight, bias)
    assert out.shape == (batch, output_dim)
    assert jnp.allclose(out, ref, atol=1e-5, rtol=1e-5)

    # Also exercise a batch that is not a multiple of the pack/tile size.
    x2 = jax.random.normal(jax.random.PRNGKey(1), (37, input_dim), dtype=jnp.float32)
    out2 = jax.block_until_ready(lff_forward(x2, weight, bias))
    assert out2.shape == (37, output_dim)
    assert jnp.allclose(out2, lff_reference(x2, weight, bias), atol=1e-5, rtol=1e-5)

    print("KERNEL_OK")
</pallas_src>

<mosaic_0001>
module attributes {stable_mosaic.version = 11 : i64} {
  func.func @_lff_kernel(%arg0: i32, %arg1: memref<8x128xf32, #tpu.memory_space<vmem>>, %arg2: memref<128x1024xf32, #tpu.memory_space<vmem>>, %arg3: memref<1x1024xf32, #tpu.memory_space<vmem>>, %arg4: memref<8x1024xf32, #tpu.memory_space<vmem>>) attributes {dimension_semantics = [#tpu.dimension_semantics<parallel>], iteration_bounds = array<i64: 1>, scalar_prefetch = 0 : i64, scratch_operands = 0 : i64, tpu.core_type = #tpu.core_type<tc>, window_params = [{transform_indices = @transform_0, window_bounds = array<i64: 8, 128>}, {pipeline_mode = #tpu.pipeline_mode<synchronous>, transform_indices = @transform_1, window_bounds = array<i64: 128, 1024>}, {pipeline_mode = #tpu.pipeline_mode<synchronous>, transform_indices = @transform_2, window_bounds = array<i64: 1, 1024>}, {transform_indices = @transform_3, window_bounds = array<i64: 8, 1024>}]} {
    %c0 = arith.constant 0 : index
    %c0_0 = arith.constant 0 : index
    %0 = vector.load %arg1[%c0, %c0_0] : memref<8x128xf32, #tpu.memory_space<vmem>>, vector<8x128xf32>
    %c0_1 = arith.constant 0 : index
    %c0_2 = arith.constant 0 : index
    %1 = vector.load %arg2[%c0_1, %c0_2] : memref<128x1024xf32, #tpu.memory_space<vmem>>, vector<128x1024xf32>
    %cst = arith.constant dense<0.000000e+00> : vector<8x1024xf32>
    %2 = tpu.matmul %0, %1, %cst {dimension_numbers = #tpu.dot_dimension_numbers<[1], [0], [0], [1], [0, 0, 1, 1], [], []>} : vector<8x128xf32>, vector<128x1024xf32>, vector<8x1024xf32> -> vector<8x1024xf32>
    %c0_3 = arith.constant 0 : index
    %c0_4 = arith.constant 0 : index
    %3 = vector.load %arg3[%c0_3, %c0_4] : memref<1x1024xf32, #tpu.memory_space<vmem>>, vector<1x1024xf32>
    %4 = vector.broadcast %3 : vector<1x1024xf32> to vector<8x1024xf32>
    %5 = arith.addf %2, %4 : vector<8x1024xf32>
    %6 = math.sin %5 : vector<8x1024xf32>
    %c0_5 = arith.constant 0 : index
    %c0_6 = arith.constant 0 : index
    %7 = vector.load %arg4[%c0_5, %c0_6] : memref<8x1024xf32, #tpu.memory_space<vmem>>, vector<8x1024xf32>
    tpu.vector_store %arg4[%c0_5, %c0_6], %6 {strides = array<i32>} : memref<8x1024xf32, #tpu.memory_space<vmem>>, vector<8x1024xf32>,
    return
  }
  func.func @transform_0(%arg0: i32) -> (i32, i32) {
    %c0_i32 = arith.constant 0 : i32
    %c0_i32_0 = arith.constant 0 : i32
    return %arg0, %c0_i32 : i32, i32
  }
  func.func @transform_1(%arg0: i32) -> (i32, i32) {
    %c0_i32 = arith.constant 0 : i32
    %c0_i32_0 = arith.constant 0 : i32
    %c0_i32_1 = arith.constant 0 : i32
    return %c0_i32, %c0_i32_0 : i32, i32
  }
  func.func @transform_2(%arg0: i32) -> (i32, i32) {
    %c0_i32 = arith.constant 0 : i32
    %c0_i32_0 = arith.constant 0 : i32
    %c0_i32_1 = arith.constant 0 : i32
    return %c0_i32, %c0_i32_0 : i32, i32
  }
  func.func @transform_3(%arg0: i32) -> (i32, i32) {
    %c0_i32 = arith.constant 0 : i32
    %c0_i32_0 = arith.constant 0 : i32
    return %arg0, %c0_i32 : i32, i32
  }
}

</mosaic_0001>

<bundles_post_ra>
// kernel: tpu_custom_call.1
= control target key start
LH: loop header
LB: loop body
LE: loop exit
PB: predicated region body
PF: predicated region fallthrough
CT: control target
= control target key end

     0   :  { %8 = vsyncpa [#allocation3], 0  ;;  %s2184_s0 = inlined_call_operand.hbm [shape: f32[8,128], index: 0, kind: input, shape index: {}]   ;;  %s2185_s1 = inlined_call_operand.hbm [shape: f32[128,1024], index: 1, kind: input, shape index: {}]   ;;  %s2186_s2 = inlined_call_operand.hbm [shape: f32[1,1024], index: 2, kind: input, shape index: {}]   ;;  %s2187_s3 = inlined_call_operand.hbm [shape: f32[8,1024], index: 3, kind: output, shape index: {}]  }
   0x1   :  { %9 = vsyncpa [#allocation6], 0 }
   0x2   :  { %10 = vsyncpa [#allocation4], 0  ;;  %s1559_s12 = smov [#allocation5]  }
   0x3   :  { %s26_s13 = sshll.u32 %s1559_s12, 4  ;;  %s27_s13 = int_to_ptr.vmem [resolvable:$true] %s26_s13 }
   0x4   :  { %s1481_s14 = scalar_lea.vmem %s27_s13, 16384  ;;  %p1486_p1 = scmp.lt.s32.totalorder %s27_s13, %s27_s13 }
   0x5   :  { %p1482_p0 = scmp.ne.s32.totalorder %s27_s13, %s1481_s14  ;;  %p1487_p2 = scmp.lt.s32.totalorder %s1481_s14, %s1481_s14 }
   0x7   :  { %p1488_p3 = por %p1487_p2, %p1486_p1 }
   0x9   :  { %p1489_p4 = pnand %p1488_p3, %p1482_p0 }
   0xb   :  { %1492 = shalt.err (!%p1489_p4)
}
   0xc   :  { %s1560_s15 = smov 1024   ;;  %s1561_s16 = smov 64  }
   0xd   :  { %32 = dma.hbm_to_vmem [thread:$0]  %s2185_s1, 16384, %s27_s13, [#allocation6], %s1560_s15, %s1560_s15, %s1561_s16  }
   0xe   :  { %s1562_s19 = smov [#allocation2]   ;;  %s1563_s21 = smov [#allocation7]  }
   0xf   :  { %s17_s20 = sshll.u32 %s1562_s19, 4  ;;  %s39_s22 = sshll.u32 %s1563_s21, 4  ;;  %s18_s20 = int_to_ptr.vmem [resolvable:$true] %s17_s20  ;;  %s40_s22 = int_to_ptr.vmem [resolvable:$true] %s39_s22 }
  0x10   :  { %s1501_s23 = scalar_lea.vmem %s18_s20, 128  ;;  %p1506_p6 = scmp.lt.s32.totalorder %s18_s20, %s18_s20 }
  0x11   :  { %p1502_p5 = scmp.ne.s32.totalorder %s18_s20, %s1501_s23  ;;  %p1507_p7 = scmp.lt.s32.totalorder %s1501_s23, %s1501_s23 }
  0x13   :  { %p1508_p8 = por %p1507_p7, %p1506_p6 }
  0x15   :  { %p1509_p9 = pnand %p1508_p8, %p1502_p5 }
  0x17   :  { %1512 = shalt.err (!%p1509_p9)
}
  0x18   :  { %20 = dma.hbm_to_vmem [thread:$0]  %s2184_s0, 128, %s18_s20, [#allocation3]  }
  0x19   :  { %s1521_s26 = scalar_lea.vmem %s40_s22, 128  ;;  %p1526_p11 = scmp.lt.s32.totalorder %s40_s22, %s40_s22 }
  0x1a   :  { %p1522_p10 = scmp.ne.s32.totalorder %s40_s22, %s1521_s26  ;;  %p1527_p12 = scmp.lt.s32.totalorder %s1521_s26, %s1521_s26 }
  0x1c   :  { %p1528_p13 = por %p1527_p12, %p1526_p11 }
  0x1e   :  { %p1529_p0 = pnand %p1528_p13, %p1522_p10 }
  0x20   :  { %1532 = shalt.err (!%p1529_p0)
}
  0x21   :  { %42 = dma.hbm_to_vmem [thread:$0]  %s2186_s2, 128, %s40_s22, [#allocation6]  }
  0x22   :  { %1553 = dma.done.wait [#allocation3], 128  }
  0x23   :  { %1554 = vsyncadd [#allocation3], 4294967168 }
  0x24   :  { %1555 = dma.done.wait [#allocation6], 16512  }
  0x25   :  { %1556 = vsyncadd [#allocation6], 4294950784  ;;  %v1564_v0 = vmov 0.0   ;;  %v174_v1 = vld [vmem:[#allocation5 + $0x3c8] sm:$0xff]  ;;  %v176_v2 = vld [vmem:[#allocation5 + $0x3d8] sm:$0xff]  ;;  %s1571_s0 = smov [#allocation8]  }
  0x26   :  { %287 = vmatprep.mubr.f32.mxu0 %v1564_v0  ;;  %358 = vmatprep.mubr.f32.mxu1 %v1564_v0  ;;  %v173_v3 = vld [vmem:[#allocation5 + $0x3c0] sm:$0xff]  ;;  %v175_v4 = vld [vmem:[#allocation5 + $0x3d0] sm:$0xff]  ;;  %v166_v5 = vld [vmem:[#allocation5 + $0x388] sm:$0xff]  ;;  %s1353_s2 = sshll.u32 %s1571_s0, 4  ;;  %s1354_s2 = int_to_ptr.vmem [resolvable:$true] %s1353_s2 }
  0x27   :  { %223 = vmatprep.subr.mxu0 %v174_v1  ;;  %294 = vmatprep.subr.mxu1 %v176_v2  ;;  %v168_v6 = vld [vmem:[#allocation5 + $0x398] sm:$0xff]  ;;  %v165_v7 = vld [vmem:[#allocation5 + $0x380] sm:$0xff]  ;;  %v167_v8 = vld [vmem:[#allocation5 + $0x390] sm:$0xff]  ;;  %s1533_s28 = scalar_lea.vmem %s1354_s2, 1024  ;;  %p1538_p2 = scmp.lt.s32.totalorder %s1354_s2, %s1354_s2 }
  0x28   :  { %224 = vmatpush1.msra.mxu0 %v173_v3  ;;  %295 = vmatpush1.msra.mxu1 %v175_v4  ;;  %v158_v9 = vld [vmem:[#allocation5 + $0x348] sm:$0xff]  ;;  %v160_v10 = vld [vmem:[#allocation5 + $0x358] sm:$0xff]  ;;  %v157_v11 = vld [vmem:[#allocation5 + $0x340] sm:$0xff]  ;;  %p1534_p1 = scmp.ne.s32.totalorder %s1354_s2, %s1533_s28  ;;  %p1539_p3 = scmp.lt.s32.totalorder %s1533_s28, %s1533_s28 }
  0x29   :  { %225 = vmatprep.subr.mxu0 %v166_v5  ;;  %296 = vmatprep.subr.mxu1 %v168_v6  ;;  %v159_v12 = vld [vmem:[#allocation5 + $0x350] sm:$0xff]  ;;  %v150_v13 = vld [vmem:[#allocation5 + $0x308] sm:$0xff]  ;;  %v152_v14 = vld [vmem:[#allocation5 + $0x318] sm:$0xff] }
  0x2a   :  { %226 = vmatpush1.msra.mxu0 %v165_v7  ;;  %297 = vmatpush1.msra.mxu1 %v167_v8  ;;  %v149_v15 = vld [vmem:[#allocation5 + $0x300] sm:$0xff]  ;;  %v151_v16 = vld [vmem:[#allocation5 + $0x310] sm:$0xff]  ;;  %v142_v17 = vld [vmem:[#allocation5 + $0x2c8] sm:$0xff]  ;;  %p1540_p4 = por %p1539_p3, %p1538_p2 }
  0x2b   :  { %227 = vmatprep.subr.mxu0 %v158_v9  ;;  %298 = vmatprep.subr.mxu1 %v160_v10  ;;  %v144_v18 = vld [vmem:[#allocation5 + $0x2d8] sm:$0xff]  ;;  %v141_v19 = vld [vmem:[#allocation5 + $0x2c0] sm:$0xff]  ;;  %v143_v20 = vld [vmem:[#allocation5 + $0x2d0] sm:$0xff] }
  0x2c   :  { %228 = vmatpush1.msra.mxu0 %v157_v11  ;;  %299 = vmatpush1.msra.mxu1 %v159_v12  ;;  %v134_v21 = vld [vmem:[#allocation5 + $0x288] sm:$0xff]  ;;  %v136_v22 = vld [vmem:[#allocation5 + $0x298] sm:$0xff]  ;;  %v133_v23 = vld [vmem:[#allocation5 + $0x280] sm:$0xff]  ;;  %p1541_p5 = pnand %p1540_p4, %p1534_p1 }
  0x2d   :  { %229 = vmatprep.subr.mxu0 %v150_v13  ;;  %300 = vmatprep.subr.mxu1 %v152_v14  ;;  %v135_v24 = vld [vmem:[#allocation5 + $0x290] sm:$0xff]  ;;  %v126_v25 = vld [vmem:[#allocation5 + $0x248] sm:$0xff]  ;;  %v128_v26 = vld [vmem:[#allocation5 + $0x258] sm:$0xff] }
  0x2e   :  { %230 = vmatpush1.msra.mxu0 %v149_v15  ;;  %301 = vmatpush1.msra.mxu1 %v151_v16  ;;  %v125_v27 = vld [vmem:[#allocation5 + $0x240] sm:$0xff]  ;;  %v127_v28 = vld [vmem:[#allocation5 + $0x250] sm:$0xff]  ;;  %v118_v29 = vld [vmem:[#allocation5 + $0x208] sm:$0xff] }
  0x2f   :  { %231 = vmatprep.subr.mxu0 %v142_v17  ;;  %302 = vmatprep.subr.mxu1 %v144_v18  ;;  %v120_v30 = vld [vmem:[#allocation5 + $0x218] sm:$0xff]  ;;  %v117_v31 = vld [vmem:[#allocation5 + $0x200] sm:$0xff]  ;;  %v119_v32 = vld [vmem:[#allocation5 + $0x210] sm:$0xff] }
  0x30   :  { %232 = vmatpush1.msra.mxu0 %v141_v19  ;;  %303 = vmatpush1.msra.mxu1 %v143_v20  ;;  %v110_v33 = vld [vmem:[#allocation5 + $0x1c8] sm:$0xff]  ;;  %v112_v34 = vld [vmem:[#allocation5 + $0x1d8] sm:$0xff]  ;;  %v109_v35 = vld [vmem:[#allocation5 + $0x1c0] sm:$0xff] }
  0x31   :  { %233 = vmatprep.subr.mxu0 %v134_v21  ;;  %304 = vmatprep.subr.mxu1 %v136_v22  ;;  %v111_v36 = vld [vmem:[#allocation5 + $0x1d0] sm:$0xff]  ;;  %v102_v37 = vld [vmem:[#allocation5 + $0x188] sm:$0xff]  ;;  %v104_v38 = vld [vmem:[#allocation5 + $0x198] sm:$0xff] }
  0x32   :  { %234 = vmatpush1.msra.mxu0 %v133_v23  ;;  %305 = vmatpush1.msra.mxu1 %v135_v24  ;;  %v101_v39 = vld [vmem:[#allocation5 + $0x180] sm:$0xff]  ;;  %v103_v40 = vld [vmem:[#allocation5 + $0x190] sm:$0xff]  ;;  %v94_v41 = vld [vmem:[#allocation5 + $0x148] sm:$0xff] }
  0x33   :  { %235 = vmatprep.subr.mxu0 %v126_v25  ;;  %306 = vmatprep.subr.mxu1 %v128_v26  ;;  %v96_v42 = vld [vmem:[#allocation5 + $0x158] sm:$0xff]  ;;  %v93_v43 = vld [vmem:[#allocation5 + $0x140] sm:$0xff]  ;;  %v95_v44 = vld [vmem:[#allocation5 + $0x150] sm:$0xff] }
  0x34   :  { %236 = vmatpush1.msra.mxu0 %v125_v27  ;;  %307 = vmatpush1.msra.mxu1 %v127_v28  ;;  %v86_v45 = vld [vmem:[#allocation5 + $0x108] sm:$0xff]  ;;  %v88_v46 = vld [vmem:[#allocation5 + $0x118] sm:$0xff]  ;;  %v85_v47 = vld [vmem:[#allocation5 + $0x100] sm:$0xff] }
  0x35   :  { %237 = vmatprep.subr.mxu0 %v118_v29  ;;  %308 = vmatprep.subr.mxu1 %v120_v30  ;;  %v87_v48 = vld [vmem:[#allocation5 + $0x110] sm:$0xff]  ;;  %v78_v49 = vld [vmem:[#allocation5 + $0xc8] sm:$0xff]  ;;  %v80_v50 = vld [vmem:[#allocation5 + $0xd8] sm:$0xff] }
  0x36   :  { %238 = vmatpush1.msra.mxu0 %v117_v31  ;;  %309 = vmatpush1.msra.mxu1 %v119_v32  ;;  %v77_v51 = vld [vmem:[#allocation5 + $0xc0] sm:$0xff]  ;;  %v79_v52 = vld [vmem:[#allocation5 + $0xd0] sm:$0xff]  ;;  %v70_v53 = vld [vmem:[#allocation5 + $0x88] sm:$0xff] }
  0x37   :  { %239 = vmatprep.subr.mxu0 %v110_v33  ;;  %310 = vmatprep.subr.mxu1 %v112_v34  ;;  %v72_v54 = vld [vmem:[#allocation5 + $0x98] sm:$0xff]  ;;  %v69_v55 = vld [vmem:[#allocation5 + $0x80] sm:$0xff]  ;;  %v71_v56 = vld [vmem:[#allocation5 + $0x90] sm:$0xff] }
  0x38   :  { %240 = vmatpush1.msra.mxu0 %v109_v35  ;;  %311 = vmatpush1.msra.mxu1 %v111_v36  ;;  %v62_v57 = vld [vmem:[#allocation5 + $0x48] sm:$0xff]  ;;  %v64_v58 = vld [vmem:[#allocation5 + $0x58] sm:$0xff]  ;;  %v61_v59 = vld [vmem:[#allocation5 + $0x40] sm:$0xff] }
  0x39   :  { %241 = vmatprep.subr.mxu0 %v102_v37  ;;  %312 = vmatprep.subr.mxu1 %v104_v38  ;;  %v63_v60 = vld [vmem:[#allocation5 + $0x50] sm:$0xff]  ;;  %v54_v61 = vld [vmem:[#allocation5 + $0x8] sm:$0xff]  ;;  %v56_v62 = vld [vmem:[#allocation5 + $0x18] sm:$0xff] }
  0x3a   :  { %242 = vmatpush1.msra.mxu0 %v101_v39  ;;  %313 = vmatpush1.msra.mxu1 %v103_v40  ;;  %v53_v63 = vld [vmem:[#allocation5] sm:$0xff]  ;;  %v55_v1 = vld [vmem:[#allocation5 + $0x10] sm:$0xff]  ;;  %v1603_v2 = vld [vmem:[#allocation2] sm:$0xff] }
  0x3b   :  { %243 = vmatprep.subr.mxu0 %v94_v41  ;;  %314 = vmatprep.subr.mxu1 %v96_v42  ;;  %v178_v3 = vld [vmem:[#allocation5 + $0x3e8] sm:$0xff]  ;;  %v180_v4 = vld [vmem:[#allocation5 + $0x3f8] sm:$0xff]  ;;  %v177_v5 = vld [vmem:[#allocation5 + $0x3e0] sm:$0xff] }
  0x3c   :  { %244 = vmatpush1.msra.mxu0 %v93_v43  ;;  %315 = vmatpush1.msra.mxu1 %v95_v44  ;;  %v179_v6 = vld [vmem:[#allocation5 + $0x3f0] sm:$0xff]  ;;  %v170_v7 = vld [vmem:[#allocation5 + $0x3a8] sm:$0xff]  ;;  %v172_v8 = vld [vmem:[#allocation5 + $0x3b8] sm:$0xff] }
  0x3d   :  { %245 = vmatprep.subr.mxu0 %v86_v45  ;;  %316 = vmatprep.subr.mxu1 %v88_v46  ;;  %v169_v9 = vld [vmem:[#allocation5 + $0x3a0] sm:$0xff]  ;;  %v171_v10 = vld [vmem:[#allocation5 + $0x3b0] sm:$0xff]  ;;  %v162_v11 = vld [vmem:[#allocation5 + $0x368] sm:$0xff] }
  0x3e   :  { %246 = vmatpush1.msra.mxu0 %v85_v47  ;;  %317 = vmatpush1.msra.mxu1 %v87_v48  ;;  %v164_v12 = vld [vmem:[#allocation5 + $0x378] sm:$0xff]  ;;  %v161_v13 = vld [vmem:[#allocation5 + $0x360] sm:$0xff]  ;;  %v163_v14 = vld [vmem:[#allocation5 + $0x370] sm:$0xff] }
  0x3f   :  { %247 = vmatprep.subr.mxu0 %v78_v49  ;;  %318 = vmatprep.subr.mxu1 %v80_v50  ;;  %v154_v15 = vld [vmem:[#allocation5 + $0x328] sm:$0xff]  ;;  %v156_v16 = vld [vmem:[#allocation5 + $0x338] sm:$0xff]  ;;  %v153_v17 = vld [vmem:[#allocation5 + $0x320] sm:$0xff] }
  0x40   :  { %248 = vmatpush1.msra.mxu0 %v77_v51  ;;  %319 = vmatpush1.msra.mxu1 %v79_v52  ;;  %v155_v18 = vld [vmem:[#allocation5 + $0x330] sm:$0xff]  ;;  %v146_v19 = vld [vmem:[#allocation5 + $0x2e8] sm:$0xff]  ;;  %v148_v20 = vld [vmem:[#allocation5 + $0x2f8] sm:$0xff] }
  0x41   :  { %249 = vmatprep.subr.mxu0 %v70_v53  ;;  %320 = vmatprep.subr.mxu1 %v72_v54  ;;  %v145_v21 = vld [vmem:[#allocation5 + $0x2e0] sm:$0xff]  ;;  %v147_v22 = vld [vmem:[#allocation5 + $0x2f0] sm:$0xff]  ;;  %v138_v23 = vld [vmem:[#allocation5 + $0x2a8] sm:$0xff] }
  0x42   :  { %250 = vmatpush1.msra.mxu0 %v69_v55  ;;  %321 = vmatpush1.msra.mxu1 %v71_v56  ;;  %v140_v24 = vld [vmem:[#allocation5 + $0x2b8] sm:$0xff]  ;;  %v137_v25 = vld [vmem:[#allocation5 + $0x2a0] sm:$0xff]  ;;  %v139_v26 = vld [vmem:[#allocation5 + $0x2b0] sm:$0xff] }
  0x43   :  { %251 = vmatprep.subr.mxu0 %v62_v57  ;;  %322 = vmatprep.subr.mxu1 %v64_v58  ;;  %v130_v27 = vld [vmem:[#allocation5 + $0x268] sm:$0xff]  ;;  %v132_v28 = vld [vmem:[#allocation5 + $0x278] sm:$0xff]  ;;  %v129_v29 = vld [vmem:[#allocation5 + $0x260] sm:$0xff] }
  0x44   :  { %252 = vmatpush1.msra.mxu0 %v61_v59  ;;  %323 = vmatpush1.msra.mxu1 %v63_v60  ;;  %v131_v30 = vld [vmem:[#allocation5 + $0x270] sm:$0xff]  ;;  %v122_v31 = vld [vmem:[#allocation5 + $0x228] sm:$0xff]  ;;  %v124_v32 = vld [vmem:[#allocation5 + $0x238] sm:$0xff] }
  0x45   :  { %253 = vmatprep.subr.mxu0 %v54_v61  ;;  %324 = vmatprep.subr.mxu1 %v56_v62  ;;  %v121_v33 = vld [vmem:[#allocation5 + $0x220] sm:$0xff]  ;;  %v123_v34 = vld [vmem:[#allocation5 + $0x230] sm:$0xff]  ;;  %v114_v35 = vld [vmem:[#allocation5 + $0x1e8] sm:$0xff] }
  0x46   :  { %254 = vmatpush1.msra.mxu0 %v53_v63  ;;  %325 = vmatpush1.msra.mxu1 %v55_v1  ;;  %v116_v36 = vld [vmem:[#allocation5 + $0x1f8] sm:$0xff]  ;;  %v113_v37 = vld [vmem:[#allocation5 + $0x1e0] sm:$0xff]  ;;  %v115_v38 = vld [vmem:[#allocation5 + $0x1f0] sm:$0xff] }
  0x47   :  { %288 = vmatmul.mubr.f32.vlgmr.msra.gmra.mxu0 %v1603_v2  ;;  %359 = vmatmul.mubr.f32.vlgmr.msra.gmra.mxu1 %v1603_v2  ;;  %v106_v39 = vld [vmem:[#allocation5 + $0x1a8] sm:$0xff]  ;;  %v108_v40 = vld [vmem:[#allocation5 + $0x1b8] sm:$0xff]  ;;  %v105_v41 = vld [vmem:[#allocation5 + $0x1a0] sm:$0xff] }
  0x48   :  { %365 = vmatprep.subr.mxu0 %v178_v3  ;;  %436 = vmatprep.subr.mxu1 %v180_v4  ;;  %v107_v42 = vld [vmem:[#allocation5 + $0x1b0] sm:$0xff]  ;;  %v98_v43 = vld [vmem:[#allocation5 + $0x168] sm:$0xff]  ;;  %v100_v44 = vld [vmem:[#allocation5 + $0x178] sm:$0xff] }
  0x49   :  { %366 = vmatpush1.msra.mxu0 %v177_v5  ;;  %437 = vmatpush1.msra.mxu1 %v179_v6  ;;  %v97_v45 = vld [vmem:[#allocation5 + $0x160] sm:$0xff]  ;;  %v99_v46 = vld [vmem:[#allocation5 + $0x170] sm:$0xff]  ;;  %v90_v47 = vld [vmem:[#allocation5 + $0x128] sm:$0xff]  ;;  %v183_v5 = vlaneseq }
  0x4a   :  { %367 = vmatprep.subr.mxu0 %v170_v7  ;;  %438 = vmatprep.subr.mxu1 %v172_v8  ;;  %v92_v48 = vld [vmem:[#allocation5 + $0x138] sm:$0xff]  ;;  %v89_v49 = vld [vmem:[#allocation5 + $0x120] sm:$0xff]  ;;  %v91_v50 = vld [vmem:[#allocation5 + $0x130] sm:$0xff] }
  0x4b   :  { %368 = vmatpush1.msra.mxu0 %v169_v9  ;;  %439 = vmatpush1.msra.mxu1 %v171_v10  ;;  %v82_v51 = vld [vmem:[#allocation5 + $0xe8] sm:$0xff]  ;;  %v84_v52 = vld [vmem:[#allocation5 + $0xf8] sm:$0xff]  ;;  %v81_v53 = vld [vmem:[#allocation5 + $0xe0] sm:$0xff]  ;;  %v1611_v6 = vshrl.u32 %v183_v5, 7 }
  0x4c   :  { %369 = vmatprep.subr.mxu0 %v162_v11  ;;  %440 = vmatprep.subr.mxu1 %v164_v12  ;;  %v83_v54 = vld [vmem:[#allocation5 + $0xf0] sm:$0xff]  ;;  %v74_v55 = vld [vmem:[#allocation5 + $0xa8] sm:$0xff]  ;;  %v76_v56 = vld [vmem:[#allocation5 + $0xb8] sm:$0xff] }
  0x4d   :  { %370 = vmatpush1.msra.mxu0 %v161_v13  ;;  %441 = vmatpush1.msra.mxu1 %v163_v14  ;;  %v73_v57 = vld [vmem:[#allocation5 + $0xa0] sm:$0xff]  ;;  %v75_v58 = vld [vmem:[#allocation5 + $0xb0] sm:$0xff]  ;;  %v66_v59 = vld [vmem:[#allocation5 + $0x68] sm:$0xff]  ;;  %v185_v7 = vsub.s32 0, %v1611_v6  ;;  %v193_v8 = vsub.s32 2, %v1611_v6  ;;  %v189_v12 = vsub.s32 1, %v1611_v6 }
  0x4e   :  { %371 = vmatprep.subr.mxu0 %v154_v15  ;;  %442 = vmatprep.subr.mxu1 %v156_v16  ;;  %v68_v60 = vld [vmem:[#allocation5 + $0x78] sm:$0xff]  ;;  %v65_v61 = vld [vmem:[#allocation5 + $0x60] sm:$0xff]  ;;  %v67_v62 = vld [vmem:[#allocation5 + $0x70] sm:$0xff] }
  0x4f   :  { %372 = vmatpush1.msra.mxu0 %v153_v17  ;;  %443 = vmatpush1.msra.mxu1 %v155_v18  ;;  %v58_v63 = vld [vmem:[#allocation5 + $0x28] sm:$0xff]  ;;  %v60_v1 = vld [vmem:[#allocation5 + $0x38] sm:$0xff]  ;;  %v57_v3 = vld [vmem:[#allocation5 + $0x20] sm:$0xff] }
  0x50   :  { %373 = vmatprep.subr.mxu0 %v146_v19  ;;  %444 = vmatprep.subr.mxu1 %v148_v20  ;;  %v59_v4 = vld [vmem:[#allocation5 + $0x30] sm:$0xff]  ;;  %v1615_v9 = vld [vmem:[#allocation7] sm:$0xff] }
  0x51   :  { %374 = vmatpush1.msra.mxu0 %v145_v21  ;;  %445 = vmatpush1.msra.mxu1 %v147_v22  ;;  %v186_v10 = vrot.slane %v1615_v9, %v185_v7  ;;  %v194_v11 = vrot.slane %v1615_v9, %v193_v8  ;;  %v190_v15 = vrot.slane %v1615_v9, %v189_v12 }
  0x52   :  { %375 = vmatprep.subr.mxu0 %v138_v23  ;;  %446 = vmatprep.subr.mxu1 %v140_v24  ;;  %v197_v24 = vsub.s32 3, %v1611_v6 }
  0x53   :  { %376 = vmatpush1.msra.mxu0 %v137_v25  ;;  %447 = vmatpush1.msra.mxu1 %v139_v26 }
  0x54   :  { %377 = vmatprep.subr.mxu0 %v130_v27  ;;  %448 = vmatprep.subr.mxu1 %v132_v28 }
  0x55   :  { %378 = vmatpush1.msra.mxu0 %v129_v29  ;;  %449 = vmatpush1.msra.mxu1 %v131_v30 }
  0x56   :  { %379 = vmatprep.subr.mxu0 %v122_v31  ;;  %450 = vmatprep.subr.mxu1 %v124_v32  ;;  %v198_v32 = vrot.slane %v1615_v9, %v197_v24 }
  0x57   :  { %380 = vmatpush1.msra.mxu0 %v121_v33  ;;  %451 = vmatpush1.msra.mxu1 %v123_v34 }
  0x58   :  { %381 = vmatprep.subr.mxu0 %v114_v35  ;;  %452 = vmatprep.subr.mxu1 %v116_v36 }
  0x59   :  { %382 = vmatpush1.msra.mxu0 %v113_v37  ;;  %453 = vmatpush1.msra.mxu1 %v115_v38 }
  0x5a   :  { %383 = vmatprep.subr.mxu0 %v106_v39  ;;  %454 = vmatprep.subr.mxu1 %v108_v40 }
  0x5b   :  { %384 = vmatpush1.msra.mxu0 %v105_v41  ;;  %455 = vmatpush1.msra.mxu1 %v107_v42 }
  0x5c   :  { %385 = vmatprep.subr.mxu0 %v98_v43  ;;  %456 = vmatprep.subr.mxu1 %v100_v44 }
  0x5d   :  { %386 = vmatpush1.msra.mxu0 %v97_v45  ;;  %457 = vmatpush1.msra.mxu1 %v99_v46 }
  0x5e   :  { %387 = vmatprep.subr.mxu0 %v90_v47  ;;  %458 = vmatprep.subr.mxu1 %v92_v48 }
  0x5f   :  { %388 = vmatpush1.msra.mxu0 %v89_v49  ;;  %459 = vmatpush1.msra.mxu1 %v91_v50  ;;  %v1565_v49 = vmov 683565275  }
  0x60   :  { %389 = vmatprep.subr.mxu0 %v82_v51  ;;  %460 = vmatprep.subr.mxu1 %v84_v52 }
  0x61   :  { %390 = vmatpush1.msra.mxu0 %v81_v53  ;;  %461 = vmatpush1.msra.mxu1 %v83_v54  ;;  %v1566_v53 = vmov 2475754826  }
  0x62   :  { %391 = vmatprep.subr.mxu0 %v74_v55  ;;  %462 = vmatprep.subr.mxu1 %v76_v56  ;;  %v1567_v55 = vmov 2131351028  }
  0x63   :  { %392 = vmatpush1.msra.mxu0 %v73_v57  ;;  %463 = vmatpush1.msra.mxu1 %v75_v58  ;;  %v1568_v57 = vmov 2102212464  }
  0x64   :  { %393 = vmatprep.subr.mxu0 %v66_v59  ;;  %464 = vmatprep.subr.mxu1 %v68_v60  ;;  %v1569_v59 = vmov 920167782  }
  0x65   :  { %394 = vmatpush1.msra.mxu0 %v65_v61  ;;  %465 = vmatpush1.msra.mxu1 %v67_v62 }
  0x66   :  { %395 = vmatprep.subr.mxu0 %v58_v63  ;;  %466 = vmatprep.subr.mxu1 %v60_v1 }
  0x67   :  { %396 = vmatpush1.msra.mxu0 %v57_v3  ;;  %429 = vmatprep.mubr.f32.mxu0 %v1564_v0 }
  0x68   :  { %467 = vmatpush1.msra.mxu1 %v59_v4  ;;  %500 = vmatprep.mubr.f32.mxu1 %v1564_v0  ;;  %v1570_v4 = vmov 1326507024  }
  0x69   :  { %430 = vmatmul.mubr.f32.vlgmr.msra.gmra.mxu0 %v1603_v2  ;;  %501 = vmatmul.mubr.f32.vlgmr.msra.gmra.mxu1 %v1603_v2 }
 0x107   :  { %v289_v0 = vpop.f32.mrf.mxu0  ;;  %v360_v13 = vpop.f32.mrf.mxu1 }
 0x108   :  { %v1620_v14 = vadd.f32 %v289_v0, %v186_v10  ;;  %v1622_v2 = vadd.f32 %v360_v13, %v194_v11 }
 0x109   :  { %v291_v16 = vpop.f32.mrf.mxu0  ;;  %v362_v37 = vpop.f32.mrf.mxu1 }
 0x10a   :  { %v507_v17 = vand.u32 2147483647, %v1620_v14  ;;  %v510_v18 = vand.u32 2139095040, %v1620_v14  ;;  %v715_v19 = vand.u32 2147483647, %v1622_v2  ;;  %v718_v20 = vand.u32 2139095040, %v1622_v2 }
 0x10b   :  { %v1631_v23 = vadd.f32 %v291_v16, %v190_v15  ;;  %v1639_v43 = vadd.f32 %v362_v37, %v198_v32  ;;  %vm509_vm13 = vcmp.lt.s32.totalorder %v1620_v14, 0 }
 0x10c   :  { %v511_v21 = vshrl.u32 %v510_v18, 23  ;;  %v514_v22 = vand.u32 8388607, %v507_v17  ;;  %v719_v25 = vshrl.u32 %v718_v20, 23  ;;  %v722_v26 = vand.u32 8388607, %v715_v19 }
 0x10d   :  { %v614_v29 = vand.u32 2139095040, %v1631_v23  ;;  %v611_v35 = vand.u32 2147483647, %v1631_v23  ;;  %vm1749_vm14 = vcmp.le.f32.partialorder %v507_v17, 0.7853982 }
 0x10e   :  { %v1363_v27 = vadd.s32 4294967169, %v511_v21  ;;  %v1371_v28 = vadd.s32 4294967169, %v719_v25  ;;  %v515_v30 = vor.u32 8388608, %v514_v22  ;;  %v723_v33 = vor.u32 8388608, %v722_v26 }
 0x10f   :  { %v615_v36 = vshrl.u32 %v614_v29, 23  ;;  %v1649_v47 = vand.u32 8388607, %v611_v35 }
 0x110   :  { %v517_v31 = vadd.s32 1, %v1363_v27  ;;  %v725_v34 = vadd.s32 1, %v1371_v28  ;;  %v1641_v44 = vshll.u32 %v515_v30, 8  ;;  %v1645_v46 = vshll.u32 %v723_v33, 8 }
 0x111   :  { %v1367_v39 = vadd.s32 4294967169, %v615_v36 }
 0x112   :  { %vm518_vm0 = vcmp.gt.s32.totalorder %v517_v31, 0  ;;  %vm726_vm1 = vcmp.gt.s32.totalorder %v725_v34, 0 }
 0x113   :  { %v519_v38 = vsel %vm518_vm0, %v517_v31, 0  ;;  %v727_v42 = vsel %vm726_vm1, %v725_v34, 0  ;;  %v1652_v52 = vadd.s32 1, %v1367_v39 }
 0x114   :  { %v520_v40 = vshrl.u32 %v519_v38, 5  ;;  %v521_v41 = vand.u32 31, %v519_v38  ;;  %v1643_v45 = vshrl.u32 %v727_v42, 5  ;;  %v729_v51 = vand.u32 31, %v727_v42 }
 0x115   :  { %vm622_vm11 = vcmp.gt.s32.totalorder %v1652_v52, 0 }
 0x116   :  { %v522_v48 = vsub.s32 32, %v521_v41  ;;  %v524_v50 = vshll.u32 %v1565_v49, %v521_v41  ;;  %v527_v54 = vshll.u32 %v1566_v53, %v521_v41  ;;  %v530_v56 = vshll.u32 %v1567_v55, %v521_v41 }
 0x117   :  { %v533_v58 = vshll.u32 %v1568_v57, %v521_v41  ;;  %v536_v60 = vshll.u32 %v1569_v59, %v521_v41  ;;  %vm539_vm2 = vcmp.lt.s32.totalorder %v520_v40, 1  ;;  %vm540_vm3 = vcmp.lt.s32.totalorder %v520_v40, 2 }
 0x118   :  { %v525_v61 = vshrl.u32 %v1566_v53, %v522_v48  ;;  %v528_v62 = vshrl.u32 %v1567_v55, %v522_v48  ;;  %v531_v63 = vshrl.u32 %v1568_v57, %v522_v48  ;;  %v523_v1 = vshrl.u32 %v1565_v49, %v522_v48 }
 0x119   :  { %v534_v3 = vshrl.u32 %v1569_v59, %v522_v48  ;;  %v537_v5 = vshrl.u32 %v1570_v4, %v522_v48  ;;  %v730_v11 = vsub.s32 32, %v729_v51  ;;  %vm541_vm4 = vcmp.lt.s32.totalorder %v520_v40, 3 }
 0x11a   :  { %v526_v7 = vor.u32 %v525_v61, %v524_v50  ;;  %v529_v8 = vor.u32 %v528_v62, %v527_v54  ;;  %v532_v10 = vor.u32 %v531_v63, %v530_v56  ;;  %vm542_vm5 = vcmp.lt.s32.totalorder %v520_v40, 4 }
 0x11b   :  { %v535_v12 = vor.u32 %v534_v3, %v533_v58  ;;  %v538_v0 = vor.u32 %v537_v5, %v536_v60  ;;  %v732_v24 = vshll.u32 %v1565_v49, %v729_v51  ;;  %v733_v27 = vshrl.u32 %v1566_v53, %v730_v11 }
 0x11c   :  { %v543_v13 = vsel %vm539_vm2, %v523_v1, %v526_v7  ;;  %v544_v15 = vsel %vm542_vm5, %v532_v10, 2102212464  ;;  %v547_v16 = vsel %vm539_vm2, %v526_v7, %v529_v8  ;;  %v551_v18 = vsel %vm539_vm2, %v529_v8, %v532_v10 }
 0x11d   :  { %v545_v20 = vsel %vm541_vm4, %v529_v8, %v544_v15  ;;  %v548_v21 = vsel %vm542_vm5, %v535_v12, 920167782  ;;  %v552_v22 = vsel %vm542_vm5, %v538_v0, 1326507024  ;;  %v735_v28 = vshll.u32 %v1566_v53, %v729_v51 }
 0x11e   :  { %v549_v25 = vsel %vm541_vm4, %v532_v10, %v548_v21  ;;  %v553_v26 = vsel %vm541_vm4, %v535_v12, %v552_v22  ;;  %v546_v29 = vsel %vm540_vm3, %v543_v13, %v545_v20  ;;  %v736_v32 = vshrl.u32 %v1567_v55, %v730_v11 }
 0x11f   :  { %v550_v30 = vsel %vm540_vm3, %v547_v16, %v549_v25  ;;  %v554_v31 = vsel %vm540_vm3, %v551_v18, %v553_v26  ;;  %v734_v38 = vor.u32 %v733_v27, %v732_v24  ;;  %v738_v41 = vshll.u32 %v1567_v55, %v729_v51 }
 0x120   :  { %v1675_v33 = vmul.u32.u64.low %v1641_v44, %v554_v31  ;;  %v1676_v34 = vmul.u32.u64.high %v1641_v44, %v554_v31, %v1675_v33  ;;  %v1679_v36 = vmul.u32.u64.low %v1641_v44, %v550_v30  ;;  %v1680_v37 = vmul.u32.u64.high %v1641_v44, %v550_v30, %v1679_v36 }
 0x121   :  { %v737_v39 = vor.u32 %v736_v32, %v735_v28  ;;  %v739_v42 = vshrl.u32 %v1568_v57, %v730_v11  ;;  %v731_v48 = vshrl.u32 %v1565_v49, %v730_v11  ;;  %v741_v40 = vshll.u32 %v1568_v57, %v729_v51 }
 0x122   :  { %v742_v50 = vshrl.u32 %v1569_v59, %v730_v11  ;;  %v745_v54 = vshrl.u32 %v1570_v4, %v730_v11  ;;  %v562_v56 = vmul.u32 %v1641_v44, %v546_v29  ;;  %v744_v60 = vshll.u32 %v1569_v59, %v729_v51 }
 0x123   :  { %v740_v58 = vor.u32 %v739_v42, %v738_v41  ;;  %vm747_vm6 = vcmp.lt.s32.totalorder %v1643_v45, 1  ;;  %vm564_vm7 = vc.u32 %v1676_v34, %v1679_v36  ;;  %v565_v61 = vadd.s32 1, %v1680_v37 }
 0x124   :  { %v743_v62 = vor.u32 %v742_v50, %v741_v40  ;;  %vm748_vm8 = vcmp.lt.s32.totalorder %v1643_v45, 2  ;;  %v746_v63 = vor.u32 %v745_v54, %v744_v60  ;;  %vm749_vm9 = vcmp.lt.s32.totalorder %v1643_v45, 3 }
 0x125   :  { %vm750_vm10 = vcmp.lt.s32.totalorder %v1643_v45, 4  ;;  %v755_v1 = vsel %vm747_vm6, %v734_v38, %v737_v39  ;;  %v566_v44 = vsel %vm564_vm7, %v565_v61, %v1680_v37  ;;  %v759_v51 = vsel %vm747_vm6, %v737_v39, %v740_v58 }
 0x126   :  { %v752_v3 = vsel %vm750_vm10, %v740_v58, 2102212464  ;;  %v756_v5 = vsel %vm750_vm10, %v743_v62, 920167782  ;;  %v567_v7 = vadd.s32 %v566_v44, %v562_v56  ;;  %v751_v8 = vsel %vm747_vm6, %v731_v48, %v734_v38 }
 0x127   :  { %v757_v10 = vsel %vm749_vm9, %v740_v58, %v756_v5  ;;  %v760_v11 = vsel %vm750_vm10, %v746_v63, 1326507024  ;;  %v753_v12 = vsel %vm749_vm9, %v737_v39, %v752_v3  ;;  %v623_v24 = vsel %vm622_vm11, %v1652_v52, 0 }
 0x128   :  { %v758_v0 = vsel %vm748_vm8, %v755_v1, %v757_v10  ;;  %v761_v13 = vsel %vm749_vm9, %v743_v62, %v760_v11  ;;  %v568_v15 = vadd.s32 536870912, %v567_v7  ;;  %v754_v26 = vsel %vm748_vm8, %v751_v8, %v753_v12 }
 0x129   :  { %v762_v16 = vsel %vm748_vm8, %v759_v51, %v761_v13  ;;  %v1703_v18 = vmul.u32.u64.low %v1645_v46, %v758_v0  ;;  %v1704_v20 = vmul.u32.u64.high %v1645_v46, %v758_v0, %v1703_v18  ;;  %v625_v27 = vand.u32 31, %v623_v24 }
 0x12a   :  { %v1708_v21 = vmul.u32.u64.low %v1645_v46, %v762_v16  ;;  %v1709_v22 = vmul.u32.u64.high %v1645_v46, %v762_v16, %v1708_v21  ;;  %v569_v25 = vshrl.u32 %v568_v15, 30  ;;  %v822_v28 = vand.u32 2139095040, %v1639_v43 }
 0x12b   :  { %v201_v29 = vsub.s32 4, %v1611_v6  ;;  %v773_v31 = vadd.s32 1, %v1704_v20  ;;  %v619_v32 = vor.u32 8388608, %v1649_v47  ;;  %v770_v33 = vmul.u32 %v1645_v46, %v754_v26 }
 0x12c   :  { %v570_v30 = vshll.u32 %v569_v25, 30  ;;  %vm772_vm12 = vc.u32 %v1709_v22, %v1703_v18  ;;  %v626_v52 = vsub.s32 32, %v625_v27  ;;  %v823_v38 = vshrl.u32 %v822_v28, 23 }
 0x12d   :  { %v774_v45 = vsel %vm772_vm12, %v773_v31, %v1704_v20  ;;  %v1726_v41 = vrot.slane %v1615_v9, %v201_v29  ;;  %v209_v42 = vsub.s32 6, %v1611_v6  ;;  %v563_v47 = vadd.s32 %v1679_v36, %v1676_v34 }
 0x12e   :  { %v1721_v37 = vsub.s32 %v567_v7, %v570_v30  ;;  %v775_v39 = vadd.s32 %v774_v45, %v770_v33  ;;  %v1731_v48 = vshll.u32 %v619_v32, 8  ;;  %v819_v40 = vand.u32 2147483647, %v1639_v43 }
 0x12f   :  { %v1734_v54 = vshrl.u32 %v623_v24, 5  ;;  %v629_v56 = vshrl.u32 %v1566_v53, %v626_v52  ;;  %v632_v58 = vshrl.u32 %v1567_v55, %v626_v52  ;;  %v635_v61 = vshrl.u32 %v1568_v57, %v626_v52 }
 0x130   :  { %v573_v46 = vsub.s32 0, %v1721_v37  ;;  %v776_v50 = vadd.s32 536870912, %v775_v39  ;;  %v638_v62 = vshrl.u32 %v1569_v59, %v626_v52  ;;  %v1741_v34 = vadd.s32 4294967169, %v823_v38 }
 0x131   :  { %v593_v36 = vsub.s32 4, %v569_v25  ;;  %v628_v1 = vshll.u32 %v1565_v49, %v625_v27  ;;  %v631_v44 = vshll.u32 %v1566_v53, %v625_v27  ;;  %v634_v51 = vshll.u32 %v1567_v55, %v625_v27 }
 0x132   :  { %v1364_v60 = vmin.u32 %v573_v46, %v1721_v37  ;;  %v1743_v63 = vshrl.u32 %v776_v50, 30  ;;  %v637_v7 = vshll.u32 %v1568_v57, %v625_v27  ;;  %v641_v8 = vshrl.u32 %v1570_v4, %v626_v52 }
 0x133   :  { %v630_v11 = vor.u32 %v629_v56, %v628_v1  ;;  %v633_v12 = vor.u32 %v632_v58, %v631_v44  ;;  %v1759_v0 = vand.u32 8388607, %v819_v40  ;;  %v636_v17 = vor.u32 %v635_v61, %v634_v51 }
 0x134   :  { %v575_v5 = vclz %v1364_v60  ;;  %v778_v10 = vshll.u32 %v1743_v63, 30  ;;  %v639_v15 = vor.u32 %v638_v62, %v637_v7  ;;  %v640_v16 = vshll.u32 %v1569_v59, %v625_v27 }
 0x135   :  { %v594_v20 = vsel %vm509_vm13, %v593_v36, %v569_v25  ;;  %v627_v24 = vshrl.u32 %v1565_v49, %v626_v52  ;;  %vm643_vm15 = vcmp.lt.s32.totalorder %v1734_v54, 1  ;;  %vm644_vm1 = vcmp.lt.s32.totalorder %v1734_v54, 2 }
 0x136   :  { %v1365_v13 = vadd.s32 4294967294, %v575_v5  ;;  %v1764_v21 = vsub.s32 %v775_v39, %v778_v10  ;;  %v642_v26 = vor.u32 %v641_v8, %v640_v16  ;;  %vm645_vm2 = vcmp.lt.s32.totalorder %v1734_v54, 3 }
 0x137   :  { %vm717_vm3 = vcmp.lt.s32.totalorder %v1622_v2, 0  ;;  %vm646_vm4 = vcmp.lt.s32.totalorder %v1734_v54, 4  ;;  %v651_v25 = vsel %vm643_vm15, %v630_v11, %v633_v12  ;;  %v655_v38 = vsel %vm643_vm15, %v633_v12, %v636_v17 }
 0x138   :  { %vm1366_vm0 = vcmp.lt.s32.totalorder %v1365_v13, 0  ;;  %v781_v27 = vsub.s32 0, %v1764_v21  ;;  %v648_v31 = vsel %vm646_vm4, %v636_v17, 2102212464  ;;  %v652_v32 = vsel %vm646_vm4, %v639_v15, 920167782 }
 0x139   :  { %v578_v28 = vsel %vm1366_vm0, 0, %v1365_v13  ;;  %v653_v45 = vsel %vm645_vm2, %v636_v17, %v652_v32  ;;  %v656_v56 = vsel %vm646_vm4, %v642_v26, 1326507024  ;;  %v596_v58 = vsel %vm1749_vm14, 0, %v594_v20  ;;  %v431_v32 = vpop.f32.mrf.mxu0 }
 0x13a   :  { %v579_v29 = vsub.s32 32, %v578_v28  ;;  %v583_v30 = vsub.s32 4294967266, %v578_v28  ;;  %v580_v33 = vshll.u32 %v1721_v37, %v578_v28  ;;  %v1372_v52 = vmin.u32 %v781_v27, %v1764_v21 }
 0x13b   :  { %v654_v50 = vsel %vm644_vm1, %v651_v25, %v653_v45  ;;  %vm1787_vm5 = vcmp.le.f32.partialorder %v715_v19, 0.7853982  ;;  %v647_v61 = vsel %vm643_vm15, %v627_v24, %v630_v11  ;;  %v801_v1 = vsub.s32 4, %v1743_v63 }
 0x13c   :  { %v581_v39 = vshrl.u32 %v563_v47, %v579_v29  ;;  %v584_v46 = vadd.s32 127, %v583_v30  ;;  %v783_v60 = vclz %v1372_v52  ;;  %v649_v47 = vsel %vm645_vm2, %v633_v12, %v648_v31 }
 0x13d   :  { %v657_v44 = vsel %vm645_vm2, %v639_v15, %v656_v56  ;;  %v1801_v51 = vmul.u32.u64.low %v1731_v48, %v654_v50  ;;  %v1802_v7 = vmul.u32.u64.high %v1731_v48, %v654_v50, %v1801_v51  ;;  %v650_v10 = vsel %vm644_vm1, %v647_v61, %v649_v47 }
 0x13e   :  { %v582_v62 = vor.u32 %v581_v39, %v580_v33  ;;  %v585_v36 = vshll.u32 %v584_v46, 23  ;;  %v1373_v5 = vadd.s32 4294967294, %v783_v60  ;;  %v658_v19 = vsel %vm644_vm1, %v655_v38, %v657_v44 }
 0x13f   :  { %v1808_v11 = vmul.u32.u64.low %v1731_v48, %v658_v19  ;;  %v1809_v12 = vmul.u32.u64.high %v1731_v48, %v658_v19, %v1808_v11  ;;  %v600_v13 = vadd.s32 3, %v596_v58  ;;  %v771_v17 = vadd.s32 %v1703_v18, %v1709_v22 }
 0x140   :  { %v586_v8 = vor.u32 4788187, %v585_v36  ;;  %vm1374_vm6 = vcmp.lt.s32.totalorder %v1373_v5, 0  ;;  %v829_v15 = vadd.s32 1, %v1741_v34  ;;  %v589_v20 = vcvt.s32.f32 %v582_v62 }
 0x141   :  { %v786_v24 = vsel %vm1374_vm6, 0, %v1373_v5  ;;  %v802_v26 = vsel %vm717_vm3, %v801_v1, %v1743_v63  ;;  %v666_v27 = vmul.u32 %v1731_v48, %v650_v10  ;;  %v669_v25 = vadd.s32 1, %v1802_v7 }
 0x142   :  { %v587_v16 = vand.u32 2147483647, %v586_v8  ;;  %v787_v54 = vsub.s32 32, %v786_v24  ;;  %v791_v28 = vsub.s32 4294967266, %v786_v24  ;;  %v788_v30 = vshll.u32 %v1764_v21, %v786_v24 }
 0x143   :  { %vm668_vm7 = vc.u32 %v1809_v12, %v1801_v51  ;;  %vm830_vm8 = vcmp.gt.s32.totalorder %v829_v15, 0  ;;  %v804_v33 = vsel %vm1787_vm5, 0, %v802_v26  ;;  %v1828_v21 = vrot.slane %v1615_v9, %v209_v42 }
 0x144   :  { %v590_v29 = vmul.f32 %v589_v20, %v587_v16  ;;  %v789_v18 = vshrl.u32 %v771_v17, %v787_v54  ;;  %v792_v22 = vadd.s32 127, %v791_v28  ;;  %v670_v34 = vsel %vm668_vm7, %v669_v25, %v1802_v7 }
 0x145   :  { %v831_v31 = vsel %vm830_vm8, %v829_v15, 0  ;;  %v671_v48 = vadd.s32 %v670_v34, %v666_v27  ;;  %v1833_v56 = vadd.f32 %v431_v32, %v1726_v41  ;;  %v1838_v60 = vand.u32 3, %v600_v13 }
 0x146   :  { %v591_v63 = vxor.u32 2147483648, %v590_v29  ;;  %v833_v52 = vand.u32 31, %v831_v31  ;;  %v790_v45 = vor.u32 %v789_v18, %v788_v30  ;;  %v793_v38 = vshll.u32 %v792_v22, 23 }
 0x147   :  { %v672_v46 = vadd.s32 536870912, %v671_v48  ;;  %v1840_v47 = vadd.s32 3, %v804_v33  ;;  %v827_v62 = vor.u32 8388608, %v1759_v0  ;;  %vm613_vm9 = vcmp.lt.s32.totalorder %v1631_v23, 0 }
 0x148   :  { %v592_v39 = vsel %vm509_vm13, %v591_v63, %v590_v29  ;;  %v834_v50 = vsub.s32 32, %v833_v52  ;;  %v794_v61 = vor.u32 4788187, %v793_v38  ;;  %v797_v44 = vcvt.s32.f32 %v790_v45 }
 0x149   :  { %v595_v58 = vsel %vm1749_vm14, %v1620_v14, %v592_v39  ;;  %v673_v42 = vshrl.u32 %v672_v46, 30  ;;  %v1846_v5 = vshrl.u32 %v831_v31, 5  ;;  %v836_v19 = vshll.u32 %v1565_v49, %v833_v52 }
 0x14a   :  { %1440 = vcosq.f32 %v595_v58  ;;  %v837_v36 = vshrl.u32 %v1566_v53, %v834_v50  ;;  %v795_v1 = vand.u32 2147483647, %v794_v61  ;;  %v840_v41 = vshrl.u32 %v1567_v55, %v834_v50 }
 0x14b   :  { %1442 = vsinq.f32 %v595_v58  ;;  %v674_v3 = vshll.u32 %v673_v42, 30  ;;  %v843_v7 = vshrl.u32 %v1568_v57, %v834_v50  ;;  %v839_v10 = vshll.u32 %v1566_v53, %v833_v52 }
 0x14c   :  { %v798_v8 = vmul.f32 %v797_v44, %v795_v1  ;;  %v845_v0 = vshll.u32 %v1568_v57, %v833_v52  ;;  %v846_v11 = vshrl.u32 %v1569_v59, %v834_v50  ;;  %v838_v17 = vor.u32 %v837_v36, %v836_v19 }
 0x14d   :  { %v1853_v13 = vsub.s32 %v671_v48, %v674_v3  ;;  %v842_v15 = vshll.u32 %v1567_v55, %v833_v52  ;;  %v926_v16 = vand.u32 2139095040, %v1833_v56  ;;  %v841_v24 = vor.u32 %v840_v41, %v839_v10 }
 0x14e   :  { %v799_v20 = vxor.u32 2147483648, %v798_v8  ;;  %v847_v26 = vor.u32 %v846_v11, %v845_v0  ;;  %v849_v54 = vshrl.u32 %v1570_v4, %v834_v50  ;;  %v667_v28 = vadd.s32 %v1801_v51, %v1809_v12 }
 0x14f   :  { %v677_v27 = vsub.s32 0, %v1853_v13  ;;  %v844_v25 = vor.u32 %v843_v7, %v842_v15  ;;  %v848_v29 = vshll.u32 %v1569_v59, %v833_v52  ;;  %vm606_vm10 = vcmp.eq.s32.totalorder %v1838_v60, 2 }
 0x150   :  { %v800_v30 = vsel %vm717_vm3, %v799_v20, %v798_v8  ;;  %v697_v18 = vsub.s32 4, %v673_v42  ;;  %vm851_vm11 = vcmp.lt.s32.totalorder %v1846_v5, 1  ;;  %v867_v22 = vshll.u32 %v827_v62, 8 }
 0x151   :  { %vm603_vm12 = vcmp.eq.s32.totalorder %v1838_v60, 0  ;;  %v803_v51 = vsel %vm1787_vm5, %v1622_v2, %v800_v30  ;;  %v1368_v12 = vmin.u32 %v677_v27, %v1853_v13  ;;  %v850_v34 = vor.u32 %v849_v54, %v848_v29 }
 0x152   :  { %vm854_vm13 = vcmp.lt.s32.totalorder %v1846_v5, 4  ;;  %vm602_vm14 = vcmp.lt.s32.totalorder %v1838_v60, 2  ;;  %1444 = vcosq.f32 %v803_v51  ;;  %v835_v31 = vshrl.u32 %v1565_v49, %v834_v50 }
 0x153   :  { %v859_v32 = vsel %vm851_vm11, %v838_v17, %v841_v24  ;;  %v860_v63 = vsel %vm854_vm13, %v847_v26, 920167782  ;;  %vm599_vm15 = vweird.f32 %v1620_v14  ;;  %1446 = vsinq.f32 %v803_v51 }
 0x154   :  { %vm1881_vm0 = vcmp.le.f32.partialorder %v611_v35, 0.7853982  ;;  %v679_v33 = vclz %v1368_v12  ;;  %vm853_vm1 = vcmp.lt.s32.totalorder %v1846_v5, 3  ;;  %v856_v48 = vsel %vm854_vm13, %v844_v25, 2102212464 }
 0x155   :  { %v698_v52 = vsel %vm613_vm9, %v697_v18, %v673_v42  ;;  %vm852_vm2 = vcmp.lt.s32.totalorder %v1846_v5, 2  ;;  %v861_v45 = vsel %vm853_vm1, %v844_v25, %v860_v63  ;;  %v863_v38 = vsel %vm851_vm11, %v841_v24, %v844_v25 }
 0x156   :  { %v1369_v39 = vadd.s32 4294967294, %v679_v33  ;;  %v855_v35 = vsel %vm851_vm11, %v835_v31, %v838_v17  ;;  %v862_v46 = vsel %vm852_vm2, %v859_v32, %v861_v45  ;;  %v864_v50 = vsel %vm854_vm13, %v850_v34, 1326507024 }
 0x157   :  { %v1441_v58 = vpop.eup %1440  ;;  %v857_v61 = vsel %vm853_vm1, %v841_v24, %v856_v48  ;;  %v865_v62 = vsel %vm853_vm1, %v847_v26, %v864_v50  ;;  %v1899_v42 = vmul.u32.u64.low %v867_v22, %v862_v46  ;;  %v1900_v36 = vmul.u32.u64.high %v867_v22, %v862_v46, %v1899_v42 }
 0x158   :  { %v1443_v1 = vpop.eup %1442  ;;  %v607_v44 = vxor.u32 2147483648, %v1441_v58  ;;  %vm1370_vm3 = vcmp.lt.s32.totalorder %v1369_v39, 0  ;;  %v866_v41 = vsel %vm852_vm2, %v863_v38, %v865_v62  ;;  %v927_v3 = vshrl.u32 %v926_v16, 23 }
 0x159   :  { %v604_v19 = vxor.u32 2147483648, %v1443_v1  ;;  %v682_v7 = vsel %vm1370_vm3, 0, %v1369_v39  ;;  %v1905_v8 = vmul.u32.u64.low %v867_v22, %v866_v41  ;;  %v1906_v10 = vmul.u32.u64.high %v867_v22, %v866_v41, %v1905_v8 }
 0x15a   :  { %v608_v0 = vsel %vm606_vm10, %v607_v44, %v1443_v1  ;;  %v683_v11 = vsub.s32 32, %v682_v7  ;;  %v687_v17 = vsub.s32 4294967266, %v682_v7  ;;  %v858_v15 = vsel %vm852_vm2, %v855_v35, %v857_v61 }
 0x15b   :  { %v605_v20 = vsel %vm603_vm12, %v1441_v58, %v604_v19  ;;  %v809_v24 = vand.u32 3, %v1840_v47  ;;  %v877_v16 = vadd.s32 1, %v1900_v36  ;;  %v1379_v26 = vadd.s32 4294967169, %v927_v3  ;;  %v502_v47 = vpop.f32.mrf.mxu1 }
 0x15c   :  { %v609_v54 = vsel %vm602_vm14, %v605_v20, %v608_v0  ;;  %v684_v27 = vshll.u32 %v1853_v13, %v682_v7  ;;  %v685_v25 = vshrl.u32 %v667_v28, %v683_v11  ;;  %v688_v29 = vadd.s32 127, %v687_v17 }
 0x15d   :  { %v610_v30 = vsel %vm599_vm15, nan, %v609_v54  ;;  %v700_v5 = vsel %vm1881_vm0, 0, %v698_v52  ;;  %v874_v18 = vmul.u32 %v867_v22, %v858_v15  ;;  %vm876_vm4 = vc.u32 %v1906_v10, %v1899_v42 }
 0x15e   :  { %1339 = vst [vmem:[#allocation8] sm:$0xff] %v610_v30  ;;  %v686_v51 = vor.u32 %v685_v25, %v684_v27  ;;  %v689_v12 = vshll.u32 %v688_v29, 23  ;;  %v878_v60 = vsel %vm876_vm4, %v877_v16, %v1900_v36  ;;  %v933_v34 = vadd.s32 1, %v1379_v26 }
 0x15f   :  { %v879_v13 = vadd.s32 %v878_v60, %v874_v18  ;;  %v923_v28 = vand.u32 2147483647, %v1833_v56  ;;  %v205_v14 = vsub.s32 5, %v1611_v6  ;;  %v1445_v31 = vpop.eup %1444  ;;  %vm814_vm5 = vcmp.eq.s32.totalorder %v809_v24, 2 }
 0x160   :  { %v690_v32 = vor.u32 4788187, %v689_v12  ;;  %vm934_vm6 = vcmp.gt.s32.totalorder %v933_v34, 0  ;;  %v1929_v22 = vadd.f32 %v502_v47, %v1828_v21  ;;  %v1447_v63 = vpop.eup %1446  ;;  %v815_v33 = vxor.u32 2147483648, %v1445_v31 }
 0x161   :  { %v704_v48 = vadd.s32 3, %v700_v5  ;;  %v880_v52 = vadd.s32 536870912, %v879_v13  ;;  %v935_v45 = vsel %vm934_vm6, %v933_v34, 0  ;;  %v812_v38 = vxor.u32 2147483648, %v1447_v63 }
 0x162   :  { %v691_v39 = vand.u32 2147483647, %v690_v32  ;;  %v693_v35 = vcvt.s32.f32 %v686_v51  ;;  %v937_v46 = vand.u32 31, %v935_v45  ;;  %vm811_vm7 = vcmp.eq.s32.totalorder %v809_v24, 0 }
 0x163   :  { %v816_v50 = vsel %vm814_vm5, %v815_v33, %v1447_v63  ;;  %v1931_v58 = vshrl.u32 %v880_v52, 30  ;;  %v930_v61 = vand.u32 8388607, %v923_v28  ;;  %vm810_vm8 = vcmp.lt.s32.totalorder %v809_v24, 2 }
 0x164   :  { %v813_v62 = vsel %vm811_vm7, %v1445_v31, %v812_v38  ;;  %v694_v21 = vmul.f32 %v693_v35, %v691_v39  ;;  %v938_v36 = vsub.s32 32, %v937_v46  ;;  %vm807_vm10 = vweird.f32 %v1622_v2 }
 0x165   :  { %v817_v1 = vsel %vm810_vm8, %v813_v62, %v816_v50  ;;  %v882_v44 = vshll.u32 %v1931_v58, 30  ;;  %v1938_v41 = vrot.slane %v1615_v9, %v205_v14  ;;  %v1940_v7 = vand.u32 3, %v704_v48 }
 0x166   :  { %v818_v3 = vsel %vm807_vm10, nan, %v817_v1  ;;  %v695_v19 = vxor.u32 2147483648, %v694_v21  ;;  %v941_v8 = vshrl.u32 %v1566_v53, %v938_v36  ;;  %v931_v11 = vor.u32 8388608, %v930_v61 }
 0x167   :  { %1341 = vst [vmem:[#allocation8 + $0x10] sm:$0xff] %v818_v3  ;;  %v1943_v0 = vsub.s32 %v879_v13, %v882_v44  ;;  %v944_v17 = vshrl.u32 %v1567_v55, %v938_v36  ;;  %v1134_v2 = vand.u32 2139095040, %v1929_v22  ;;  %v936_v20 = vshrl.u32 %v935_v45, 5 }
 0x168   :  { %v696_v15 = vsel %vm613_vm9, %v695_v19, %v694_v21  ;;  %v940_v9 = vshll.u32 %v1565_v49, %v937_v46  ;;  %v947_v24 = vshrl.u32 %v1568_v57, %v938_v36  ;;  %v943_v54 = vshll.u32 %v1566_v53, %v937_v46 }
 0x169   :  { %v699_v16 = vsel %vm1881_vm0, %v1631_v23, %v696_v15  ;;  %v885_v26 = vsub.s32 0, %v1943_v0  ;;  %v946_v27 = vshll.u32 %v1567_v55, %v937_v46  ;;  %v949_v29 = vshll.u32 %v1568_v57, %v937_v46 }
 0x16a   :  { %1448 = vcosq.f32 %v699_v16  ;;  %v942_v25 = vor.u32 %v941_v8, %v940_v9  ;;  %v950_v30 = vshrl.u32 %v1569_v59, %v938_v36  ;;  %v945_v18 = vor.u32 %v944_v17, %v943_v54 }
 0x16b   :  { %1450 = vsinq.f32 %v699_v16  ;;  %v1376_v5 = vmin.u32 %v885_v26, %v1943_v0  ;;  %v948_v47 = vor.u32 %v947_v24, %v946_v27  ;;  %v952_v37 = vshll.u32 %v1569_v59, %v937_v46 }
 0x16c   :  { %v951_v51 = vor.u32 %v950_v30, %v949_v29  ;;  %v953_v12 = vshrl.u32 %v1570_v4, %v938_v36  ;;  %v971_v60 = vshll.u32 %v931_v11, 8  ;;  %v939_v13 = vshrl.u32 %v1565_v49, %v938_v36 }
 0x16d   :  { %v887_v34 = vclz %v1376_v5  ;;  %vm955_vm9 = vcmp.lt.s32.totalorder %v936_v20, 1  ;;  %v1135_v14 = vshrl.u32 %v1134_v2, 23  ;;  %vm821_vm11 = vcmp.lt.s32.totalorder %v1639_v43, 0 }
 0x16e   :  { %v954_v31 = vor.u32 %v953_v12, %v952_v37  ;;  %vm956_vm12 = vcmp.lt.s32.totalorder %v936_v20, 2  ;;  %vm957_vm13 = vcmp.lt.s32.totalorder %v936_v20, 3  ;;  %vm958_vm14 = vcmp.lt.s32.totalorder %v936_v20, 4 }
 0x16f   :  { %v1377_v32 = vadd.s32 4294967294, %v887_v34  ;;  %v960_v63 = vsel %vm958_vm14, %v948_v47, 2102212464  ;;  %v963_v33 = vsel %vm955_vm9, %v942_v25, %v945_v18  ;;  %v964_v48 = vsel %vm958_vm14, %v951_v51, 920167782 }
 0x170   :  { %v959_v52 = vsel %vm955_vm9, %v939_v13, %v942_v25  ;;  %v965_v45 = vsel %vm957_vm13, %v948_v47, %v964_v48  ;;  %v967_v38 = vsel %vm955_vm9, %v945_v18, %v948_v47  ;;  %v968_v39 = vsel %vm958_vm14, %v954_v31, 1326507024  ;;  %v433_v31 = vpop.f32.mrf.mxu0 }
 0x171   :  { %vm1966_vm15 = vcmp.le.f32.partialorder %v819_v40, 0.7853982  ;;  %vm1378_vm0 = vcmp.lt.s32.totalorder %v1377_v32, 0  ;;  %v961_v46 = vsel %vm957_vm13, %v945_v18, %v960_v63  ;;  %v966_v50 = vsel %vm956_vm12, %v963_v33, %v965_v45 }
 0x172   :  { %v969_v61 = vsel %vm957_vm13, %v951_v51, %v968_v39  ;;  %v890_v62 = vsel %vm1378_vm0, 0, %v1377_v32  ;;  %v1972_v36 = vmul.u32.u64.low %v971_v60, %v966_v50  ;;  %v1973_v1 = vmul.u32.u64.high %v971_v60, %v966_v50, %v1972_v36 }
 0x173   :  { %v970_v21 = vsel %vm956_vm12, %v967_v38, %v969_v61  ;;  %v875_v44 = vadd.s32 %v1899_v42, %v1906_v10  ;;  %v891_v3 = vsub.s32 32, %v890_v62  ;;  %v895_v40 = vsub.s32 4294967266, %v890_v62 }
 0x174   :  { %v905_v19 = vsub.s32 4, %v1931_v58  ;;  %v1979_v8 = vmul.u32.u64.low %v971_v60, %v970_v21  ;;  %v1980_v11 = vmul.u32.u64.high %v971_v60, %v970_v21, %v1979_v8  ;;  %v1131_v17 = vand.u32 2147483647, %v1929_v22 }
 0x175   :  { %v1387_v2 = vadd.s32 4294967169, %v1135_v14  ;;  %v892_v15 = vshll.u32 %v1943_v0, %v890_v62  ;;  %v893_v9 = vshrl.u32 %v875_v44, %v891_v3  ;;  %v896_v24 = vadd.s32 127, %v895_v40 }
 0x176   :  { %v962_v16 = vsel %vm956_vm12, %v959_v52, %v961_v46  ;;  %vm706_vm1 = vcmp.lt.s32.totalorder %v1940_v7, 2  ;;  %vm707_vm2 = vcmp.eq.s32.totalorder %v1940_v7, 0  ;;  %v981_v42 = vadd.s32 1, %v1973_v1 }
 0x177   :  { %v1141_v10 = vadd.s32 1, %v1387_v2  ;;  %v1449_v26 = vpop.eup %1448  ;;  %vm710_vm3 = vcmp.eq.s32.totalorder %v1940_v7, 2  ;;  %v894_v54 = vor.u32 %v893_v9, %v892_v15  ;;  %v897_v27 = vshll.u32 %v896_v24, 23 }
 0x178   :  { %v906_v0 = vsel %vm821_vm11, %v905_v19, %v1931_v58  ;;  %v1451_v25 = vpop.eup %1450  ;;  %v711_v29 = vxor.u32 2147483648, %v1449_v26  ;;  %v978_v20 = vmul.u32 %v971_v60, %v962_v16  ;;  %vm980_vm4 = vc.u32 %v1980_v11, %v1972_v36 }
 0x179   :  { %vm1142_vm5 = vcmp.gt.s32.totalorder %v1141_v10, 0  ;;  %v708_v30 = vxor.u32 2147483648, %v1451_v25  ;;  %v898_v5 = vor.u32 4788187, %v897_v27  ;;  %v982_v18 = vsel %vm980_vm4, %v981_v42, %v1973_v1 }
 0x17a   :  { %v1138_v47 = vand.u32 8388607, %v1131_v17  ;;  %v712_v51 = vsel %vm710_vm3, %v711_v29, %v1451_v25  ;;  %v908_v37 = vsel %vm1966_vm15, 0, %v906_v0  ;;  %v983_v12 = vadd.s32 %v982_v18, %v978_v20 }
 0x17b   :  { %v1143_v58 = vsel %vm1142_vm5, %v1141_v10, 0  ;;  %v709_v60 = vsel %vm707_vm2, %v1449_v26, %v708_v30  ;;  %v899_v34 = vand.u32 2147483647, %v898_v5  ;;  %v901_v13 = vcvt.s32.f32 %v894_v54 }
 0x17c   :  { %v1145_v14 = vand.u32 31, %v1143_v58  ;;  %vm703_vm6 = vweird.f32 %v1631_v23  ;;  %v713_v32 = vsel %vm706_vm1, %v709_v60, %v712_v51  ;;  %v984_v63 = vadd.s32 536870912, %v983_v12 }
 0x17d   :  { %v714_v33 = vsel %vm703_vm6, nan, %v713_v32  ;;  %v902_v48 = vmul.f32 %v901_v13, %v899_v34  ;;  %v912_v52 = vadd.s32 3, %v908_v37  ;;  %v1139_v39 = vor.u32 8388608, %v1138_v47 }
 0x17e   :  { %v1146_v45 = vsub.s32 32, %v1145_v14  ;;  %1340 = vst [vmem:[#allocation8 + $0x8] sm:$0xff] %v714_v33  ;;  %v2004_v38 = vshrl.u32 %v984_v63, 30  ;;  %v1148_v46 = vshll.u32 %v1565_v49, %v1145_v14  ;;  %v2008_v50 = vadd.f32 %v433_v31, %v1938_v41 }
 0x17f   :  { %v903_v61 = vxor.u32 2147483648, %v902_v48  ;;  %v1151_v7 = vshll.u32 %v1566_v53, %v1145_v14  ;;  %v1154_v1 = vshll.u32 %v1567_v55, %v1145_v14  ;;  %v1144_v41 = vshrl.u32 %v1143_v58, 5 }
 0x180   :  { %v1149_v23 = vshrl.u32 %v1566_v53, %v1146_v45  ;;  %v1152_v62 = vshrl.u32 %v1567_v55, %v1146_v45  ;;  %v986_v21 = vshll.u32 %v2004_v38, 30  ;;  %v1155_v44 = vshrl.u32 %v1568_v57, %v1146_v45 }
 0x181   :  { %v1158_v3 = vshrl.u32 %v1569_v59, %v1146_v45  ;;  %v904_v40 = vsel %vm821_vm11, %v903_v61, %v902_v48  ;;  %v1157_v8 = vshll.u32 %v1568_v57, %v1145_v14  ;;  %v1160_v42 = vshll.u32 %v1569_v59, %v1145_v14 }
 0x182   :  { %v1150_v19 = vor.u32 %v1149_v23, %v1148_v46  ;;  %v907_v2 = vsel %vm1966_vm15, %v1639_v43, %v904_v40  ;;  %v2023_v15 = vsub.s32 %v983_v12, %v986_v21  ;;  %v1153_v9 = vor.u32 %v1152_v62, %v1151_v7 }
 0x183   :  { %v1156_v24 = vor.u32 %v1155_v44, %v1154_v1  ;;  %1452 = vcosq.f32 %v907_v2  ;;  %v1159_v16 = vor.u32 %v1158_v3, %v1157_v8  ;;  %v1161_v10 = vshrl.u32 %v1570_v4, %v1146_v45 }
 0x184   :  { %1454 = vsinq.f32 %v907_v2  ;;  %v989_v26 = vsub.s32 0, %v2023_v15  ;;  %v2028_v54 = vand.u32 3, %v912_v52  ;;  %vm1166_vm7 = vcmp.lt.s32.totalorder %v1144_v41, 4 }
 0x185   :  { %v1162_v27 = vor.u32 %v1161_v10, %v1160_v42  ;;  %v1030_v35 = vand.u32 2139095040, %v2008_v50  ;;  %v1147_v25 = vshrl.u32 %v1565_v49, %v1146_v45  ;;  %vm1163_vm8 = vcmp.lt.s32.totalorder %v1144_v41, 1 }
 0x186   :  { %v1380_v0 = vmin.u32 %v989_v26, %v2023_v15  ;;  %v1168_v29 = vsel %vm1166_vm7, %v1156_v24, 2102212464  ;;  %vm1164_vm10 = vcmp.lt.s32.totalorder %v1144_v41, 2  ;;  %v1171_v20 = vsel %vm1163_vm8, %v1150_v19, %v1153_v9 }
 0x187   :  { %v1172_v30 = vsel %vm1166_vm7, %v1159_v16, 920167782  ;;  %v1179_v5 = vshll.u32 %v1139_v39, 8  ;;  %vm1165_vm9 = vcmp.lt.s32.totalorder %v1144_v41, 3  ;;  %v1167_v47 = vsel %vm1163_vm8, %v1147_v25, %v1150_v19 }
 0x188   :  { %v991_v18 = vclz %v1380_v0  ;;  %v1175_v51 = vsel %vm1163_vm8, %v1153_v9, %v1156_v24  ;;  %v1169_v37 = vsel %vm1165_vm9, %v1153_v9, %v1168_v29  ;;  %v1173_v12 = vsel %vm1165_vm9, %v1156_v24, %v1172_v30 }
 0x189   :  { %v1176_v58 = vsel %vm1166_vm7, %v1162_v27, 1326507024  ;;  %v1031_v60 = vshrl.u32 %v1030_v35, 23  ;;  %v1174_v13 = vsel %vm1164_vm10, %v1171_v20, %v1173_v12  ;;  %v1027_v31 = vand.u32 2147483647, %v2008_v50 }
 0x18a   :  { %v1381_v34 = vadd.s32 4294967294, %v991_v18  ;;  %v1177_v14 = vsel %vm1165_vm9, %v1159_v16, %v1176_v58  ;;  %v2039_v63 = vmul.u32.u64.low %v1179_v5, %v1174_v13  ;;  %v2040_v33 = vmul.u32.u64.high %v1179_v5, %v1174_v13, %v2039_v63  ;;  %v1472_v58 = vld [vmem:[#allocation7] sm:$0xff] }
 0x18b   :  { %v1178_v32 = vsel %vm1164_vm10, %v1175_v51, %v1177_v14  ;;  %v1383_v48 = vadd.s32 4294967169, %v1031_v60  ;;  %v1170_v52 = vsel %vm1164_vm10, %v1167_v47, %v1169_v37  ;;  %vm911_vm12 = vweird.f32 %v1639_v43 }
 0x18c   :  { %vm1382_vm11 = vcmp.lt.s32.totalorder %v1381_v34, 0  ;;  %v2044_v45 = vmul.u32.u64.low %v1179_v5, %v1178_v32  ;;  %v2045_v39 = vmul.u32.u64.high %v1179_v5, %v1178_v32, %v2044_v45  ;;  %vm925_vm13 = vcmp.lt.s32.totalorder %v1833_v56, 0 }
 0x18d   :  { %v994_v46 = vsel %vm1382_vm11, 0, %v1381_v34  ;;  %v1037_v61 = vadd.s32 1, %v1383_v48  ;;  %vm918_vm14 = vcmp.eq.s32.totalorder %v2028_v54, 2  ;;  %v979_v23 = vadd.s32 %v1972_v36, %v1980_v11 }
 0x18e   :  { %v995_v7 = vsub.s32 32, %v994_v46  ;;  %v999_v62 = vsub.s32 4294967266, %v994_v46  ;;  %v1186_v21 = vmul.u32 %v1179_v5, %v1170_v52  ;;  %v1189_v1 = vadd.s32 1, %v2040_v33 }
 0x18f   :  { %v1034_v44 = vand.u32 8388607, %v1027_v31  ;;  %vm1038_vm15 = vcmp.gt.s32.totalorder %v1037_v61, 0  ;;  %v996_v40 = vshll.u32 %v2023_v15, %v994_v46  ;;  %vm1188_vm0 = vc.u32 %v2045_v39, %v2039_v63 }
 0x190   :  { %v1453_v3 = vpop.eup %1452  ;;  %v997_v41 = vshrl.u32 %v979_v23, %v995_v7  ;;  %v1000_v19 = vadd.s32 127, %v999_v62  ;;  %v1009_v36 = vsub.s32 4, %v2004_v38  ;;  %v1190_v11 = vsel %vm1188_vm0, %v1189_v1, %v2040_v33  ;;  %v504_v23 = vpop.f32.mrf.mxu1 }
 0x191   :  { %v1455_v8 = vpop.eup %1454  ;;  %v919_v2 = vxor.u32 2147483648, %v1453_v3  ;;  %v1039_v9 = vsel %vm1038_vm15, %v1037_v61, 0  ;;  %v1191_v10 = vadd.s32 %v1190_v11, %v1186_v21  ;;  %vm915_vm1 = vcmp.eq.s32.totalorder %v2028_v54, 0 }
 0x192   :  { %v916_v24 = vxor.u32 2147483648, %v1455_v8  ;;  %v998_v16 = vor.u32 %v997_v41, %v996_v40  ;;  %v1001_v42 = vshll.u32 %v1000_v19, 23  ;;  %vm2065_vm2 = vcmp.le.f32.partialorder %v923_v28, 0.7853982 }
 0x193   :  { %v920_v15 = vsel %vm918_vm14, %v919_v2, %v1455_v8  ;;  %v1041_v27 = vand.u32 31, %v1039_v9  ;;  %v213_v35 = vsub.s32 7, %v1611_v6  ;;  %vm914_vm3 = vcmp.lt.s32.totalorder %v2028_v54, 2 }
 0x194   :  { %v917_v0 = vsel %vm915_vm1, %v1453_v3, %v916_v24  ;;  %v1002_v25 = vor.u32 4788187, %v1001_v42  ;;  %v1192_v29 = vadd.s32 536870912, %v1191_v10  ;;  %v1010_v30 = vsel %vm925_vm13, %v1009_v36, %v2004_v38 }
 0x195   :  { %v921_v20 = vsel %vm914_vm3, %v917_v0, %v920_v15  ;;  %v1035_v5 = vor.u32 8388608, %v1034_v44  ;;  %v1042_v18 = vsub.s32 32, %v1041_v27  ;;  %v1005_v51 = vcvt.s32.f32 %v998_v16 }
 0x196   :  { %v922_v28 = vsel %vm911_vm12, nan, %v921_v20  ;;  %v1003_v47 = vand.u32 2147483647, %v1002_v25  ;;  %v2076_v37 = vshrl.u32 %v1192_v29, 30  ;;  %v214_v60 = vrot.slane %v1472_v58, %v213_v35 }
 0x197   :  { %1342 = vst [vmem:[#allocation8 + $0x18] sm:$0xff] %v922_v28  ;;  %v1045_v6 = vshrl.u32 %v1566_v53, %v1042_v18  ;;  %v1048_v54 = vshrl.u32 %v1567_v55, %v1042_v18  ;;  %v1051_v12 = vshrl.u32 %v1568_v57, %v1042_v18  ;;  %v1044_v13 = vshll.u32 %v1565_v49, %v1041_v27 }
 0x198   :  { %v1006_v34 = vmul.f32 %v1005_v51, %v1003_v47  ;;  %v1194_v38 = vshll.u32 %v2076_v37, 30  ;;  %v1047_v43 = vshll.u32 %v1566_v53, %v1041_v27  ;;  %v1040_v14 = vshrl.u32 %v1039_v9, 5 }
 0x199   :  { %v1050_v32 = vshll.u32 %v1567_v55, %v1041_v27  ;;  %v1053_v33 = vshll.u32 %v1568_v57, %v1041_v27  ;;  %v1054_v48 = vshrl.u32 %v1569_v59, %v1042_v18  ;;  %v1046_v46 = vor.u32 %v1045_v6, %v1044_v13 }
 0x19a   :  { %v1007_v52 = vxor.u32 2147483648, %v1006_v34  ;;  %v1195_v45 = vsub.s32 %v1191_v10, %v1194_v38  ;;  %v1049_v61 = vor.u32 %v1048_v54, %v1047_v43  ;;  %v1056_v21 = vshll.u32 %v1569_v59, %v1041_v27 }
 0x19b   :  { %v1052_v7 = vor.u32 %v1051_v12, %v1050_v32  ;;  %v1055_v62 = vor.u32 %v1054_v48, %v1053_v33  ;;  %v1057_v1 = vshrl.u32 %v1570_v4, %v1042_v18  ;;  %v1012_v3 = vsel %vm2065_vm2, 0, %v1010_v30 }
 0x19c   :  { %v1008_v44 = vsel %vm925_vm13, %v1007_v52, %v1006_v34  ;;  %v1197_v40 = vsub.s32 0, %v1195_v45  ;;  %v1075_v41 = vshll.u32 %v1035_v5, 8  ;;  %v1043_v8 = vshrl.u32 %v1565_v49, %v1042_v18 }
 0x19d   :  { %v1011_v19 = vsel %vm2065_vm2, %v1833_v56, %v1008_v44  ;;  %v1058_v2 = vor.u32 %v1057_v1, %v1056_v21  ;;  %v2097_v36 = vadd.f32 %v504_v23, %v214_v60  ;;  %vm1059_vm4 = vcmp.lt.s32.totalorder %v1040_v14, 1 }
 0x19e   :  { %1456 = vcosq.f32 %v1011_v19  ;;  %v1388_v11 = vmin.u32 %v1197_v40, %v1195_v45  ;;  %vm1062_vm5 = vcmp.lt.s32.totalorder %v1040_v14, 4  ;;  %v1067_v24 = vsel %vm1059_vm4, %v1046_v46, %v1049_v61 }
 0x19f   :  { %1458 = vsinq.f32 %v1011_v19  ;;  %v1064_v9 = vsel %vm1062_vm5, %v1052_v7, 2102212464  ;;  %v1068_v16 = vsel %vm1062_vm5, %v1055_v62, 920167782  ;;  %vm1060_vm6 = vcmp.lt.s32.totalorder %v1040_v14, 2 }
 0x1a0   :  { %v1199_v42 = vclz %v1388_v11  ;;  %vm1061_vm7 = vcmp.lt.s32.totalorder %v1040_v14, 3  ;;  %v1063_v10 = vsel %vm1059_vm4, %v1043_v8, %v1046_v46  ;;  %v1071_v27 = vsel %vm1059_vm4, %v1049_v61, %v1052_v7 }
 0x1a1   :  { %v1065_v15 = vsel %vm1061_vm7, %v1049_v61, %v1064_v9  ;;  %v1069_v26 = vsel %vm1061_vm7, %v1052_v7, %v1068_v16  ;;  %v1072_v35 = vsel %vm1062_vm5, %v1058_v2, 1326507024  ;;  %v1016_v20 = vadd.s32 3, %v1012_v3 }
 0x1a2   :  { %v1389_v0 = vadd.s32 4294967294, %v1199_v42  ;;  %v1070_v25 = vsel %vm1060_vm6, %v1067_v24, %v1069_v26  ;;  %v1073_v29 = vsel %vm1061_vm7, %v1055_v62, %v1072_v35  ;;  %v1066_v28 = vsel %vm1060_vm6, %v1063_v10, %v1065_v15 }
 0x1a3   :  { %v1074_v30 = vsel %vm1060_vm6, %v1071_v27, %v1073_v29  ;;  %v2099_v5 = vmul.u32.u64.low %v1075_v41, %v1070_v25  ;;  %v2100_v18 = vmul.u32.u64.high %v1075_v41, %v1070_v25, %v2099_v5  ;;  %v1238_v54 = vand.u32 2139095040, %v2097_v36 }
 0x1a4   :  { %vm1390_vm8 = vcmp.lt.s32.totalorder %v1389_v0, 0  ;;  %v2103_v47 = vmul.u32.u64.low %v1075_v41, %v1074_v30  ;;  %v2104_v51 = vmul.u32.u64.high %v1075_v41, %v1074_v30, %v2103_v47  ;;  %v1187_v12 = vadd.s32 %v2039_v63, %v2045_v39 }
 0x1a5   :  { %v1202_v6 = vsel %vm1390_vm8, 0, %v1389_v0  ;;  %v1017_v34 = vand.u32 3, %v1016_v20  ;;  %v1082_v38 = vmul.u32 %v1075_v41, %v1066_v28  ;;  %v1085_v13 = vadd.s32 1, %v2100_v18 }
 0x1a6   :  { %v1203_v58 = vsub.s32 32, %v1202_v6  ;;  %v1207_v60 = vsub.s32 4294967266, %v1202_v6  ;;  %v1239_v43 = vshrl.u32 %v1238_v54, 23  ;;  %v1204_v14 = vshll.u32 %v1195_v45, %v1202_v6 }
 0x1a7   :  { %vm1084_vm10 = vc.u32 %v2104_v51, %v2099_v5  ;;  %v1235_v52 = vand.u32 2147483647, %v2097_v36  ;;  %vm1019_vm9 = vcmp.eq.s32.totalorder %v1017_v34, 0  ;;  %vm1133_vm11 = vcmp.lt.s32.totalorder %v1929_v22, 0 }
 0x1a8   :  { %v1205_v32 = vshrl.u32 %v1187_v12, %v1203_v58  ;;  %v1208_v33 = vadd.s32 127, %v1207_v60  ;;  %v1086_v48 = vsel %vm1084_vm10, %v1085_v13, %v2100_v18  ;;  %v1391_v46 = vadd.s32 4294967169, %v1239_v43 }
 0x1a9   :  { %v1087_v39 = vadd.s32 %v1086_v48, %v1082_v38  ;;  %v1217_v7 = vsub.s32 4, %v2076_v37  ;;  %vm1022_vm12 = vcmp.eq.s32.totalorder %v1017_v34, 2  ;;  %v1242_v41 = vand.u32 8388607, %v1235_v52 }
 0x1aa   :  { %v1206_v61 = vor.u32 %v1205_v32, %v1204_v14  ;;  %v1209_v63 = vshll.u32 %v1208_v33, 23  ;;  %v1245_v45 = vadd.s32 1, %v1391_v46  ;;  %vm1018_vm14 = vcmp.lt.s32.totalorder %v1017_v34, 2 }
 0x1ab   :  { %v1457_v23 = vpop.eup %1456  ;;  %v1088_v44 = vadd.s32 536870912, %v1087_v39  ;;  %v1218_v24 = vsel %vm1133_vm11, %v1217_v7, %v2076_v37  ;;  %vm1015_vm15 = vweird.f32 %v1833_v56  ;;  %vm2128_vm0 = vcmp.le.f32.partialorder %v1131_v17, 0.7853982 }
 0x1ac   :  { %v1459_v62 = vpop.eup %1458  ;;  %v1023_v21 = vxor.u32 2147483648, %v1457_v23  ;;  %v1210_v1 = vor.u32 4788187, %v1209_v63  ;;  %v1213_v40 = vcvt.s32.f32 %v1206_v61  ;;  %vm1246_vm13 = vcmp.gt.s32.totalorder %v1245_v45, 0 }
 0x1ad   :  { %v1020_v3 = vxor.u32 2147483648, %v1459_v62  ;;  %v2118_v2 = vshrl.u32 %v1088_v44, 30  ;;  %v1247_v11 = vsel %vm1246_vm13, %v1245_v45, 0  ;;  %v1220_v37 = vsel %vm2128_vm0, 0, %v1218_v24 }
 0x1ae   :  { %v1024_v19 = vsel %vm1022_vm12, %v1023_v21, %v1459_v62  ;;  %v1211_v8 = vand.u32 2147483647, %v1210_v1  ;;  %v1249_v16 = vand.u32 31, %v1247_v11  ;;  %v1243_v29 = vor.u32 8388608, %v1242_v41 }
 0x1af   :  { %v1021_v9 = vsel %vm1019_vm9, %v1457_v23, %v1020_v3  ;;  %v1090_v15 = vshll.u32 %v2118_v2, 30  ;;  %v1248_v12 = vshrl.u32 %v1247_v11, 5  ;;  %v1224_v14 = vadd.s32 3, %v1220_v37 }
 0x1b0   :  { %v1025_v42 = vsel %vm1018_vm14, %v1021_v9, %v1024_v19  ;;  %v1214_v10 = vmul.f32 %v1213_v40, %v1211_v8  ;;  %v1250_v35 = vsub.s32 32, %v1249_v16  ;;  %v1252_v56 = vshll.u32 %v1565_v49, %v1249_v16 }
 0x1b1   :  { %v1026_v26 = vsel %vm1015_vm15, nan, %v1025_v42  ;;  %v1091_v25 = vsub.s32 %v1087_v39, %v1090_v15  ;;  %v1255_v30 = vshll.u32 %v1566_v53, %v1249_v16  ;;  %v1258_v47 = vshll.u32 %v1567_v55, %v1249_v16 }
 0x1b2   :  { %1343 = vst [vmem:[#allocation8 + $0x20] sm:$0xff] %v1026_v26  ;;  %v1215_v0 = vxor.u32 2147483648, %v1214_v10  ;;  %v1253_v20 = vshrl.u32 %v1566_v53, %v1250_v35  ;;  %v1256_v18 = vshrl.u32 %v1567_v55, %v1250_v35  ;;  %v1259_v6 = vshrl.u32 %v1568_v57, %v1250_v35 }
 0x1b3   :  { %v1093_v28 = vsub.s32 0, %v1091_v25  ;;  %v1261_v38 = vshll.u32 %v1568_v57, %v1249_v16  ;;  %v1262_v13 = vshrl.u32 %v1569_v59, %v1250_v35  ;;  %v1264_v43 = vshll.u32 %v1569_v59, %v1249_v16 }
 0x1b4   :  { %v1216_v17 = vsel %vm1133_vm11, %v1215_v0, %v1214_v10  ;;  %v1254_v58 = vor.u32 %v1253_v20, %v1252_v56  ;;  %v1257_v60 = vor.u32 %v1256_v18, %v1255_v30  ;;  %v1260_v53 = vor.u32 %v1259_v6, %v1258_v47 }
 0x1b5   :  { %v1219_v54 = vsel %vm2128_vm0, %v1929_v22, %v1216_v17  ;;  %v1384_v34 = vmin.u32 %v1093_v28, %v1091_v25  ;;  %v1265_v55 = vshrl.u32 %v1570_v4, %v1250_v35  ;;  %v1083_v32 = vadd.s32 %v2099_v5, %v2104_v51 }
 0x1b6   :  { %1460 = vcosq.f32 %v1219_v54  ;;  %v1251_v48 = vshrl.u32 %v1565_v49, %v1250_v35  ;;  %v1263_v46 = vor.u32 %v1262_v13, %v1261_v38  ;;  %v1283_v63 = vshll.u32 %v1243_v29, 8 }
 0x1b7   :  { %1462 = vsinq.f32 %v1219_v54  ;;  %v1095_v33 = vclz %v1384_v34  ;;  %v1266_v61 = vor.u32 %v1265_v55, %v1264_v43  ;;  %vm1267_vm1 = vcmp.lt.s32.totalorder %v1248_v12, 1 }
 0x1b8   :  { %vm1269_vm2 = vcmp.lt.s32.totalorder %v1248_v12, 3  ;;  %vm1270_vm3 = vcmp.lt.s32.totalorder %v1248_v12, 4  ;;  %v1275_v23 = vsel %vm1267_vm1, %v1254_v58, %v1257_v60  ;;  %v1279_v59 = vsel %vm1267_vm1, %v1257_v60, %v1260_v53 }
 0x1b9   :  { %v1385_v39 = vadd.s32 4294967294, %v1095_v33  ;;  %v1272_v57 = vsel %vm1270_vm3, %v1260_v53, 2102212464  ;;  %v1276_v7 = vsel %vm1270_vm3, %v1263_v46, 920167782  ;;  %vm1268_vm5 = vcmp.lt.s32.totalorder %v1248_v12, 2 }
 0x1ba   :  { %v1277_v4 = vsel %vm1269_vm2, %v1260_v53, %v1276_v7  ;;  %v1280_v45 = vsel %vm1270_vm3, %v1266_v61, 1326507024  ;;  %v1271_v51 = vsel %vm1267_vm1, %v1251_v48, %v1254_v58  ;;  %v1273_v44 = vsel %vm1269_vm2, %v1257_v60, %v1272_v57 }
 0x1bb   :  { %vm1386_vm4 = vcmp.lt.s32.totalorder %v1385_v39, 0  ;;  %v1278_v49 = vsel %vm1268_vm5, %v1275_v23, %v1277_v4  ;;  %v1281_v62 = vsel %vm1269_vm2, %v1263_v46, %v1280_v45  ;;  %v1225_v16 = vand.u32 3, %v1224_v14 }
 0x1bc   :  { %v1098_v5 = vsel %vm1386_vm4, 0, %v1385_v39  ;;  %v1282_v3 = vsel %vm1268_vm5, %v1279_v59, %v1281_v62  ;;  %v2160_v19 = vmul.u32.u64.low %v1283_v63, %v1278_v49  ;;  %v2161_v8 = vmul.u32.u64.high %v1283_v63, %v1278_v49, %v2160_v19 }
 0x1bd   :  { %v1099_v21 = vsub.s32 32, %v1098_v5  ;;  %v1103_v1 = vsub.s32 4294967266, %v1098_v5  ;;  %v2157_v40 = vmul.u32.u64.low %v1283_v63, %v1282_v3  ;;  %v2158_v41 = vmul.u32.u64.high %v1283_v63, %v1282_v3, %v2157_v40 }
 0x1be   :  { %v1100_v11 = vshll.u32 %v1091_v25, %v1098_v5  ;;  %v1274_v42 = vsel %vm1268_vm5, %v1271_v51, %v1273_v44  ;;  %v1293_v27 = vadd.s32 1, %v2161_v8  ;;  %vm1227_vm7 = vcmp.eq.s32.totalorder %v1225_v16, 0 }
 0x1bf   :  { %v1101_v9 = vshrl.u32 %v1083_v32, %v1099_v21  ;;  %v1104_v24 = vadd.s32 127, %v1103_v1  ;;  %vm1292_vm6 = vc.u32 %v2158_v41, %v2160_v19  ;;  %v1290_v29 = vmul.u32 %v1283_v63, %v1274_v42 }
 0x1c0   :  { %vm1230_vm8 = vcmp.eq.s32.totalorder %v1225_v16, 2  ;;  %v1294_v25 = vsel %vm1292_vm6, %v1293_v27, %v2161_v8  ;;  %vm1226_vm10 = vcmp.lt.s32.totalorder %v1225_v16, 2  ;;  %vm1223_vm9 = vweird.f32 %v1929_v22 }
 0x1c1   :  { %v1102_v10 = vor.u32 %v1101_v9, %v1100_v11  ;;  %v1105_v15 = vshll.u32 %v1104_v24, 23  ;;  %v1295_v17 = vadd.s32 %v1294_v25, %v1290_v29  ;;  %vm1029_vm11 = vcmp.lt.s32.totalorder %v2008_v50, 0 }
 0x1c2   :  { %v1113_v34 = vsub.s32 4, %v2118_v2  ;;  %vm1028_vm12 = vcmp.le.f32.partialorder %v1027_v31, 0.7853982  ;;  %v1291_v31 = vadd.s32 %v2160_v19, %v2158_v41  ;;  %vm1119_vm1 = vweird.f32 %v2008_v50 }
 0x1c3   :  { %v1461_v26 = vpop.eup %1460  ;;  %v1106_v37 = vor.u32 4788187, %v1105_v15  ;;  %v1109_v18 = vcvt.s32.f32 %v1102_v10  ;;  %v1296_v54 = vadd.s32 536870912, %v1295_v17  ;;  %vm1237_vm2 = vcmp.lt.s32.totalorder %v2097_v36, 0 }
 0x1c4   :  { %v1463_v35 = vpop.eup %1462  ;;  %v1231_v0 = vxor.u32 2147483648, %v1461_v26  ;;  %v1114_v43 = vsel %vm1029_vm11, %v1113_v34, %v2118_v2  ;;  %vm1236_vm3 = vcmp.le.f32.partialorder %v1235_v52, 0.7853982 }
 0x1c5   :  { %v1228_v56 = vxor.u32 2147483648, %v1463_v35  ;;  %v1107_v30 = vand.u32 2147483647, %v1106_v37  ;;  %v1297_v60 = vshrl.u32 %v1296_v54, 30  ;;  %v1116_v14 = vsel %vm1028_vm12, 0, %v1114_v43 }
 0x1c6   :  { %v1232_v20 = vsel %vm1230_vm8, %v1231_v0, %v1463_v35  ;;  %v1120_v48 = vadd.s32 3, %v1116_v14 }
 0x1c7   :  { %v1229_v28 = vsel %vm1227_vm7, %v1461_v26, %v1228_v56  ;;  %v1110_v6 = vmul.f32 %v1109_v18, %v1107_v30  ;;  %v1298_v38 = vshll.u32 %v1297_v60, 30  ;;  %v1321_v11 = vsub.s32 4, %v1297_v60 }
 0x1c8   :  { %v1233_v47 = vsel %vm1226_vm10, %v1229_v28, %v1232_v20  ;;  %v1121_v61 = vand.u32 3, %v1120_v48  ;;  %vm1327_vm7 = vweird.f32 %v2097_v36 }
 0x1c9   :  { %v1234_v12 = vsel %vm1223_vm9, nan, %v1233_v47  ;;  %v1111_v58 = vxor.u32 2147483648, %v1110_v6  ;;  %v1299_v22 = vsub.s32 %v1295_v17, %v1298_v38  ;;  %v1322_v16 = vsel %vm1237_vm2, %v1321_v11, %v1297_v60 }
 0x1ca   :  { %1345 = vst [vmem:[#allocation8 + $0x30] sm:$0xff] %v1234_v12  ;;  %vm1126_vm14 = vcmp.eq.s32.totalorder %v1121_v61, 2  ;;  %vm1123_vm15 = vcmp.eq.s32.totalorder %v1121_v61, 0  ;;  %vm1122_vm0 = vcmp.lt.s32.totalorder %v1121_v61, 2 }
 0x1cb   :  { %v1112_v53 = vsel %vm1029_vm11, %v1111_v58, %v1110_v6  ;;  %v1301_v55 = vsub.s32 0, %v1299_v22 }
 0x1cc   :  { %v1115_v13 = vsel %vm1028_vm12, %v2008_v50, %v1112_v53  ;;  %v1324_v50 = vsel %vm1236_vm3, 0, %v1322_v16 }
 0x1cd   :  { %1464 = vcosq.f32 %v1115_v13  ;;  %v1392_v32 = vmin.u32 %v1301_v55, %v1299_v22  ;;  %v1328_v42 = vadd.s32 3, %v1324_v50 }
 0x1ce   :  { %1466 = vsinq.f32 %v1115_v13 }
 0x1cf   :  { %v1303_v33 = vclz %v1392_v32  ;;  %v1329_v10 = vand.u32 3, %v1328_v42 }
 0x1d1   :  { %v1393_v46 = vadd.s32 4294967294, %v1303_v33  ;;  %vm1334_vm4 = vcmp.eq.s32.totalorder %v1329_v10, 2  ;;  %vm1331_vm5 = vcmp.eq.s32.totalorder %v1329_v10, 0  ;;  %vm1330_vm6 = vcmp.lt.s32.totalorder %v1329_v10, 2 }
 0x1d3   :  { %vm1394_vm13 = vcmp.lt.s32.totalorder %v1393_v46, 0 }
 0x1d4   :  { %v1306_v63 = vsel %vm1394_vm13, 0, %v1393_v46 }
 0x1d5   :  { %v1307_v39 = vsub.s32 32, %v1306_v63  ;;  %v1311_v57 = vsub.s32 4294967266, %v1306_v63  ;;  %v1308_v4 = vshll.u32 %v1299_v22, %v1306_v63 }
 0x1d7   :  { %v1309_v45 = vshrl.u32 %v1291_v31, %v1307_v39  ;;  %v1312_v2 = vadd.s32 127, %v1311_v57 }
 0x1d9   :  { %v1310_v49 = vor.u32 %v1309_v45, %v1308_v4  ;;  %v1313_v62 = vshll.u32 %v1312_v2, 23 }
 0x1da   :  { %v1465_v23 = vpop.eup %1464 }
 0x1db   :  { %v1467_v7 = vpop.eup %1466  ;;  %v1127_v59 = vxor.u32 2147483648, %v1465_v23  ;;  %v1314_v44 = vor.u32 4788187, %v1313_v62  ;;  %v1317_v41 = vcvt.s32.f32 %v1310_v49 }
 0x1dc   :  { %v1124_v5 = vxor.u32 2147483648, %v1467_v7 }
 0x1dd   :  { %v1128_v51 = vsel %vm1126_vm14, %v1127_v59, %v1467_v7  ;;  %v1315_v40 = vand.u32 2147483647, %v1314_v44 }
 0x1de   :  { %v1125_v21 = vsel %vm1123_vm15, %v1465_v23, %v1124_v5 }
 0x1df   :  { %v1129_v1 = vsel %vm1122_vm0, %v1125_v21, %v1128_v51  ;;  %v1318_v19 = vmul.f32 %v1317_v41, %v1315_v40 }
 0x1e0   :  { %v1130_v3 = vsel %vm1119_vm1, nan, %v1129_v1 }
 0x1e1   :  { %1344 = vst [vmem:[#allocation8 + $0x28] sm:$0xff] %v1130_v3  ;;  %v1319_v8 = vxor.u32 2147483648, %v1318_v19 }
 0x1e3   :  { %v1320_v9 = vsel %vm1237_vm2, %v1319_v8, %v1318_v19 }
 0x1e4   :  { %v1323_v24 = vsel %vm1236_vm3, %v2097_v36, %v1320_v9 }
 0x1e5   :  { %1468 = vcosq.f32 %v1323_v24 }
 0x1e6   :  { %1470 = vsinq.f32 %v1323_v24 }
 0x1f2   :  { %v1469_v15 = vpop.eup %1468 }
 0x1f3   :  { %v1471_v26 = vpop.eup %1470  ;;  %v1335_v27 = vxor.u32 2147483648, %v1469_v15 }
 0x1f4   :  { %v1332_v35 = vxor.u32 2147483648, %v1471_v26 }
 0x1f5   :  { %v1336_v0 = vsel %vm1334_vm4, %v1335_v27, %v1471_v26 }
 0x1f6   :  { %v1333_v52 = vsel %vm1331_vm5, %v1469_v15, %v1332_v35 }
 0x1f7   :  { %v1337_v37 = vsel %vm1330_vm6, %v1333_v52, %v1336_v0 }
 0x1f8   :  { %v1338_v29 = vsel %vm1327_vm7, nan, %v1337_v37 }
 0x1f9   :  { %1346 = vst [vmem:[#allocation8 + $0x38] sm:$0xff] %v1338_v29 }
 0x1fa   :  { %1544 = shalt.err (!%p1541_p5)
}
 0x1fb   :  { %1356 = dma.vmem_to_hbm [thread:$0]  %s1354_s2, 1024, %s2187_s3, [#allocation4]  }
 0x1fc   :  { %1557 = dma.done.wait [#allocation4], 1024  }
 0x1fd   :  { %1558 = vsyncadd [#allocation4], 4294966272 }
 0x1fe   :  { %1360 = vsyncpa [#allocation3], 1 }
 0x1ff   :  { %1361 = vsyncpa [#allocation6], 1 }
 0x200   :  { %1362 = vsyncpa [#allocation4], 1 }

</bundles_post_ra>
